<compile_context>
chip_gen: v7x
topology: tpu7x:2x2x1
jax: 0.10.0
libtpu: 0.0.40
codegen_flags: <defaults>
</compile_context>

<pallas_src>
import jax
import jax.numpy as jnp
from jax import lax
from jax.experimental import pallas as pl
from jax.experimental.pallas import tpu as pltpu

OUTPUT_DIM = 10
EMB_DIM = 64
HID_DIM = 256
N_LAYERS = 2

VOCAB_PAD = 128   # lane-dense padded vocab (embedding rows / one-hot width)
FC_PAD = 128      # lane-dense padded fc_out width
B_SUBLANE = 8     # f32 sublane multiple


def _decoder_seq_kernel(ids_ref,                              # SMEM (T, Bp) int32
                        emb_ref, h_in_ref, c_in_ref,          # VMEM inputs
                        w0_ref, b0_ref, w1_ref, b1_ref,
                        wfc_ref, bfc_ref,
                        pred_ref, h_out_ref, c_out_ref):      # VMEM outputs
    """T-step 2-layer LSTM decode; weights & state stay VMEM-resident."""
    t = pl.program_id(0)
    _, Bp, H = h_out_ref.shape
    vocab = emb_ref.shape[0]

    # Initialize the carried state (output blocks double as VMEM accumulators).
    @pl.when(t == 0)
    def _():
        h_out_ref[...] = h_in_ref[...]
        c_out_ref[...] = c_in_ref[...]

    # ---- in-kernel embedding lookup: one-hot (Bp, vocab) @ table (vocab, EMB)
    batch_iota = lax.broadcasted_iota(jnp.int32, (Bp, vocab), 0)
    vocab_iota = lax.broadcasted_iota(jnp.int32, (Bp, vocab), 1)
    onehot = jnp.zeros((Bp, vocab), jnp.float32)
    for b in range(Bp):                      # Bp is small & static (unrolled)
        tok = ids_ref[t, b]                  # scalar read from SMEM
        onehot = jnp.where((batch_iota == b) & (vocab_iota == tok), 1.0, onehot)
    x = jnp.dot(onehot, emb_ref[...], preferred_element_type=jnp.float32)  # (Bp, EMB)
    # TODO(synk): dropout on the embedding is identity (eval mode only).

    def lstm_step(x_in, h, c, w_ref, b_ref):
        # fused gates: concat([h, x]) @ [w_hh ; w_ih]  (PyTorch gate order i,f,g,o)
        hx = jnp.concatenate([h, x_in], axis=1)                  # f32 activations
        w = w_ref[...].astype(jnp.float32)                       # bf16 weights -> f32
        gates = jnp.dot(hx, w, preferred_element_type=jnp.float32) + b_ref[...]
        i_g = jax.nn.sigmoid(gates[:, 0 * H:1 * H])
        f_g = jax.nn.sigmoid(gates[:, 1 * H:2 * H])
        g_g = jnp.tanh(gates[:, 2 * H:3 * H])
        o_g = jax.nn.sigmoid(gates[:, 3 * H:4 * H])
        c_new = f_g * c + i_g * g_g
        h_new = o_g * jnp.tanh(c_new)
        return h_new, c_new

    h0n, c0n = lstm_step(x, h_out_ref[0], c_out_ref[0], w0_ref, b0_ref)
    # inter-layer dropout is identity in eval mode
    h1n, c1n = lstm_step(h0n, h_out_ref[1], c_out_ref[1], w1_ref, b1_ref)

    pred = jnp.dot(h1n, wfc_ref[...].astype(jnp.float32),
                   preferred_element_type=jnp.float32) + bfc_ref[...]   # (Bp, 128)
    pred_ref[0] = pred

    h_out_ref[0] = h0n
    c_out_ref[0] = c0n
    h_out_ref[1] = h1n
    c_out_ref[1] = c1n


def init_params(key):
    """f32 'module' parameters, weights pre-transposed to (in_features, out_features)."""
    ks = jax.random.split(key, 10)
    s = 0.05
    return {
        "embedding": jax.random.normal(ks[0], (OUTPUT_DIM, EMB_DIM), jnp.float32) * s,
        "w_ih0": jax.random.normal(ks[1], (EMB_DIM, 4 * HID_DIM), jnp.float32) * s,
        "w_hh0": jax.random.normal(ks[2], (HID_DIM, 4 * HID_DIM), jnp.float32) * s,
        "b_ih0": jax.random.normal(ks[3], (4 * HID_DIM,), jnp.float32) * s,
        "b_hh0": jax.random.normal(ks[4], (4 * HID_DIM,), jnp.float32) * s,
        "w_ih1": jax.random.normal(ks[5], (HID_DIM, 4 * HID_DIM), jnp.float32) * s,
        "w_hh1": jax.random.normal(ks[6], (HID_DIM, 4 * HID_DIM), jnp.float32) * s,
        "b_ih1": jax.random.normal(ks[7], (4 * HID_DIM,), jnp.float32) * s,
        "b_hh1": jax.random.normal(ks[8], (4 * HID_DIM,), jnp.float32) * s,
        "w_fc": jax.random.normal(ks[9], (HID_DIM, OUTPUT_DIM), jnp.float32) * s,
        "b_fc": jnp.zeros((OUTPUT_DIM,), jnp.float32),
    }


def prepare_kernel_params(p):
    """Fuse / pad / down-cast parameters once, outside the hot path."""
    emb = jnp.zeros((VOCAB_PAD, EMB_DIM), jnp.float32).at[:OUTPUT_DIM].set(p["embedding"])
    w0 = jnp.concatenate([p["w_hh0"], p["w_ih0"]], axis=0).astype(jnp.bfloat16)  # (H+EMB, 4H)
    w1 = jnp.concatenate([p["w_hh1"], p["w_ih1"]], axis=0).astype(jnp.bfloat16)  # (2H, 4H)
    b0 = (p["b_ih0"] + p["b_hh0"]).reshape(1, -1).astype(jnp.float32)
    b1 = (p["b_ih1"] + p["b_hh1"]).reshape(1, -1).astype(jnp.float32)
    wfc = (jnp.zeros((HID_DIM, FC_PAD), jnp.float32)
           .at[:, :OUTPUT_DIM].set(p["w_fc"])).astype(jnp.bfloat16)
    bfc = jnp.zeros((1, FC_PAD), jnp.float32).at[0, :OUTPUT_DIM].set(p["b_fc"])
    return {"emb": emb, "w0": w0, "b0": b0, "w1": w1, "b1": b1, "wfc": wfc, "bfc": bfc}


def _pad_batch(x, axis, target):
    pad = target - x.shape[axis]
    if pad == 0:
        return x
    widths = [(0, 0)] * x.ndim
    widths[axis] = (0, pad)
    return jnp.pad(x, widths)


def _run_decoder_kernel(ids_pad, h_pad, c_pad, kp):
    T, Bp = ids_pad.shape
    const2 = lambda t, ids: (0, 0)
    const3 = lambda t, ids: (0, 0, 0)

    grid_spec = pltpu.PrefetchScalarGridSpec(
        num_scalar_prefetch=1,
        grid=(T,),
        in_specs=[
            pl.BlockSpec((VOCAB_PAD, EMB_DIM), const2),                  # embedding table
            pl.BlockSpec((N_LAYERS, Bp, HID_DIM), const3),               # h_in
            pl.BlockSpec((N_LAYERS, Bp, HID_DIM), const3),               # c_in
            pl.BlockSpec((HID_DIM + EMB_DIM, 4 * HID_DIM), const2),      # w0 (bf16)
            pl.BlockSpec((1, 4 * HID_DIM), const2),                      # b0
            pl.BlockSpec((2 * HID_DIM, 4 * HID_DIM), const2),            # w1 (bf16)
            pl.BlockSpec((1, 4 * HID_DIM), const2),                      # b1
            pl.BlockSpec((HID_DIM, FC_PAD), const2),                     # w_fc (bf16)
            pl.BlockSpec((1, FC_PAD), const2),                           # b_fc
        ],
        out_specs=(
            pl.BlockSpec((1, Bp, FC_PAD), lambda t, ids: (t, 0, 0)),     # per-step pred
            pl.BlockSpec((N_LAYERS, Bp, HID_DIM), const3),               # h_out (resident)
            pl.BlockSpec((N_LAYERS, Bp, HID_DIM), const3),               # c_out (resident)
        ),
    )
    out_shapes = (
        jax.ShapeDtypeStruct((T, Bp, FC_PAD), jnp.float32),
        jax.ShapeDtypeStruct((N_LAYERS, Bp, HID_DIM), jnp.float32),
        jax.ShapeDtypeStruct((N_LAYERS, Bp, HID_DIM), jnp.float32),
    )

    # Advisory cost hint: weights are fetched once; matmuls are small (M=Bp).
    w_bytes = ((HID_DIM + EMB_DIM) * 4 * HID_DIM + 2 * HID_DIM * 4 * HID_DIM
               + HID_DIM * FC_PAD) * 2 + (2 * 4 * HID_DIM + FC_PAD) * 4 \
              + VOCAB_PAD * EMB_DIM * 4
    io_bytes = 4 * N_LAYERS * Bp * HID_DIM * 4 + T * Bp * FC_PAD * 4 + T * Bp * 4
    flops = 2 * T * Bp * ((HID_DIM + EMB_DIM) * 4 * HID_DIM
                          + 2 * HID_DIM * 4 * HID_DIM
                          + HID_DIM * FC_PAD + VOCAB_PAD * EMB_DIM)
    cost = pl.CostEstimate(flops=int(flops),
                           transcendentals=int(T * 2 * 5 * Bp * HID_DIM),
                           bytes_accessed=int(w_bytes + io_bytes))

    return pl.pallas_call(
        _decoder_seq_kernel,
        grid_spec=grid_spec,
        out_shape=out_shapes,
        compiler_params=pltpu.CompilerParams(dimension_semantics=("arbitrary",)),
        cost_estimate=cost,
    )(ids_pad, kp["emb"], h_pad, c_pad,
      kp["w0"], kp["b0"], kp["w1"], kp["b1"], kp["wfc"], kp["bfc"])


@jax.jit
def decoder_decode(input_ids_seq, hidden, cell, kp):
    """
    Fused multi-step greedy-style decode.
    input_ids_seq: (T, B) int32; hidden, cell: (n_layers, B, hid_dim) f32.
    Returns (predictions (T, B, output_dim), hidden, cell).
    """
    T, B = input_ids_seq.shape
    Bp = max(B_SUBLANE, ((B + B_SUBLANE - 1) // B_SUBLANE) * B_SUBLANE)
    ids_pad = _pad_batch(input_ids_seq.astype(jnp.int32), 1, Bp)
    h_pad = _pad_batch(hidden, 1, Bp)
    c_pad = _pad_batch(cell, 1, Bp)
    pred, h_out, c_out = _run_decoder_kernel(ids_pad, h_pad, c_pad, kp)
    return pred[:, :B, :OUTPUT_DIM], h_out[:, :B, :], c_out[:, :B, :]


@jax.jit
def decoder_forward(input_ids, hidden, cell, kp):
    """Single decode step; matches the PyTorch Decoder.forward (eval mode)."""
    pred, h, c = decoder_decode(input_ids[None, :], hidden, cell, kp)
    return pred[0], h, c


def _reference_decode(ids_seq, hidden, cell, kp):
    """Pure-JAX reference using the same (bf16-rounded) fused weights."""
    hp = lax.Precision.HIGHEST
    H = HID_DIM
    emb = kp["emb"]
    W0 = kp["w0"].astype(jnp.float32)
    W1 = kp["w1"].astype(jnp.float32)
    Wfc = kp["wfc"].astype(jnp.float32)[:, :OUTPUT_DIM]
    b0, b1 = kp["b0"], kp["b1"]
    bfc = kp["bfc"][:, :OUTPUT_DIM]

    def step(x, h, c, W, b):
        g = jnp.dot(jnp.concatenate([h, x], axis=1), W, precision=hp) + b
        i = jax.nn.sigmoid(g[:, :H])
        f = jax.nn.sigmoid(g[:, H:2 * H])
        gg = jnp.tanh(g[:, 2 * H:3 * H])
        o = jax.nn.sigmoid(g[:, 3 * H:])
        c_new = f * c + i * gg
        return o * jnp.tanh(c_new), c_new

    h0, h1 = hidden[0], hidden[1]
    c0, c1 = cell[0], cell[1]
    preds = []
    for t in range(ids_seq.shape[0]):
        x = emb[ids_seq[t]]
        h0, c0 = step(x, h0, c0, W0, b0)
        h1, c1 = step(h0, h1, c1, W1, b1)
        preds.append(jnp.dot(h1, Wfc, precision=hp) + bfc)
    return jnp.stack(preds), jnp.stack([h0, h1]), jnp.stack([c0, c1])


if __name__ == "__main__":
    key = jax.random.PRNGKey(0)
    kparam, ki, kh, kc = jax.random.split(key, 4)

    BATCH = 4
    T = 6

    params = init_params(kparam)
    kp = prepare_kernel_params(params)

    input_ids = jax.random.randint(ki, (BATCH,), 0, OUTPUT_DIM, dtype=jnp.int32)
    hidden = jax.random.normal(kh, (N_LAYERS, BATCH, HID_DIM), jnp.float32) * 0.1
    cell = jax.random.normal(kc, (N_LAYERS, BATCH, HID_DIM), jnp.float32) * 0.1

    # --- single step (matches the PyTorch module's forward) ---
    pred, new_h, new_c = decoder_forward(input_ids, hidden, cell, kp)
    jax.block_until_ready((pred, new_h, new_c))
    rp, rh, rc = _reference_decode(input_ids[None, :], hidden, cell, kp)
    assert pred.shape == (BATCH, OUTPUT_DIM)
    assert new_h.shape == (N_LAYERS, BATCH, HID_DIM)
    assert new_c.shape == (N_LAYERS, BATCH, HID_DIM)
    assert jnp.allclose(pred, rp[0], atol=2e-4, rtol=2e-4), "prediction mismatch"
    assert jnp.allclose(new_h, rh, atol=2e-4, rtol=2e-4), "hidden mismatch"
    assert jnp.allclose(new_c, rc, atol=2e-4, rtol=2e-4), "cell mismatch"

    # --- fused multi-step decode (weights stay VMEM-resident across T steps) ---
    ids_seq = jax.random.randint(ki, (T, BATCH), 0, OUTPUT_DIM, dtype=jnp.int32)
    preds, hT, cT = decoder_decode(ids_seq, hidden, cell, kp)
    jax.block_until_ready((preds, hT, cT))
    rps, rhT, rcT = _reference_decode(ids_seq, hidden, cell, kp)
    assert preds.shape == (T, BATCH, OUTPUT_DIM)
    assert jnp.allclose(preds, rps, atol=2e-4, rtol=2e-4), "seq prediction mismatch"
    assert jnp.allclose(hT, rhT, atol=2e-4, rtol=2e-4), "seq hidden mismatch"
    assert jnp.allclose(cT, rcT, atol=2e-4, rtol=2e-4), "seq cell mismatch"

    print("KERNEL_OK")
</pallas_src>

<mosaic_0001>
module attributes {stable_mosaic.version = 11 : i64} {
  func.func @_decoder_seq_kernel(%arg0: i32, %arg1: memref<1x8xi32, #tpu.memory_space<smem>>, %arg2: memref<128x64xf32, #tpu.memory_space<vmem>>, %arg3: memref<2x8x256xf32, #tpu.memory_space<vmem>>, %arg4: memref<2x8x256xf32, #tpu.memory_space<vmem>>, %arg5: memref<320x1024xbf16, #tpu.memory_space<vmem>>, %arg6: memref<1x1024xf32, #tpu.memory_space<vmem>>, %arg7: memref<512x1024xbf16, #tpu.memory_space<vmem>>, %arg8: memref<1x1024xf32, #tpu.memory_space<vmem>>, %arg9: memref<256x128xbf16, #tpu.memory_space<vmem>>, %arg10: memref<1x128xf32, #tpu.memory_space<vmem>>, %arg11: memref<1x8x128xf32, #tpu.memory_space<vmem>>, %arg12: memref<2x8x256xf32, #tpu.memory_space<vmem>>, %arg13: memref<2x8x256xf32, #tpu.memory_space<vmem>>) attributes {dimension_semantics = [#tpu.dimension_semantics<arbitrary>], iteration_bounds = array<i64: 1>, scalar_prefetch = 1 : i64, scratch_operands = 0 : i64, tpu.core_type = #tpu.core_type<tc>, window_params = [{pipeline_mode = #tpu.pipeline_mode<synchronous>, transform_indices = @transform_0, window_bounds = array<i64: 128, 64>}, {pipeline_mode = #tpu.pipeline_mode<synchronous>, transform_indices = @transform_1, window_bounds = array<i64: 2, 8, 256>}, {pipeline_mode = #tpu.pipeline_mode<synchronous>, transform_indices = @transform_2, window_bounds = array<i64: 2, 8, 256>}, {pipeline_mode = #tpu.pipeline_mode<synchronous>, transform_indices = @transform_3, window_bounds = array<i64: 320, 1024>}, {pipeline_mode = #tpu.pipeline_mode<synchronous>, transform_indices = @transform_4, window_bounds = array<i64: 1, 1024>}, {pipeline_mode = #tpu.pipeline_mode<synchronous>, transform_indices = @transform_5, window_bounds = array<i64: 512, 1024>}, {pipeline_mode = #tpu.pipeline_mode<synchronous>, transform_indices = @transform_6, window_bounds = array<i64: 1, 1024>}, {pipeline_mode = #tpu.pipeline_mode<synchronous>, transform_indices = @transform_7, window_bounds = array<i64: 256, 128>}, {pipeline_mode = #tpu.pipeline_mode<synchronous>, transform_indices = @transform_8, window_bounds = array<i64: 1, 128>}, {transform_indices = @transform_9, window_bounds = array<i64: 1, 8, 128>}, {pipeline_mode = #tpu.pipeline_mode<synchronous>, transform_indices = @transform_10, window_bounds = array<i64: 2, 8, 256>}, {pipeline_mode = #tpu.pipeline_mode<synchronous>, transform_indices = @transform_11, window_bounds = array<i64: 2, 8, 256>}]} {
    %c0_i32 = arith.constant 0 : i32
    %0 = arith.cmpi eq, %arg0, %c0_i32 : i32
    %1 = arith.extui %0 : i1 to i32
    %c0_i32_0 = arith.constant 0 : i32
    %2 = arith.cmpi ne, %1, %c0_i32_0 : i32
    scf.if %2 {
      %c0_61 = arith.constant 0 : index
      %c0_62 = arith.constant 0 : index
      %c0_63 = arith.constant 0 : index
      %173 = vector.load %arg3[%c0_61, %c0_62, %c0_63] : memref<2x8x256xf32, #tpu.memory_space<vmem>>, vector<2x8x256xf32>
      %c0_64 = arith.constant 0 : index
      %c0_65 = arith.constant 0 : index
      %c0_66 = arith.constant 0 : index
      %174 = vector.load %arg12[%c0_64, %c0_65, %c0_66] : memref<2x8x256xf32, #tpu.memory_space<vmem>>, vector<2x8x256xf32>
      tpu.vector_store %arg12[%c0_64, %c0_65, %c0_66], %173 {strides = array<i32>} : memref<2x8x256xf32, #tpu.memory_space<vmem>>, vector<2x8x256xf32>,
      %c0_67 = arith.constant 0 : index
      %c0_68 = arith.constant 0 : index
      %c0_69 = arith.constant 0 : index
      %175 = vector.load %arg4[%c0_67, %c0_68, %c0_69] : memref<2x8x256xf32, #tpu.memory_space<vmem>>, vector<2x8x256xf32>
      %c0_70 = arith.constant 0 : index
      %c0_71 = arith.constant 0 : index
      %c0_72 = arith.constant 0 : index
      %176 = vector.load %arg13[%c0_70, %c0_71, %c0_72] : memref<2x8x256xf32, #tpu.memory_space<vmem>>, vector<2x8x256xf32>
      tpu.vector_store %arg13[%c0_70, %c0_71, %c0_72], %175 {strides = array<i32>} : memref<2x8x256xf32, #tpu.memory_space<vmem>>, vector<2x8x256xf32>,
    } else {
    }
    %3 = tpu.iota {dimensions = array<i32: 0>} : vector<8x128xi32>
    %4 = tpu.iota {dimensions = array<i32: 1>} : vector<8x128xi32>
    %cst = arith.constant 0.000000e+00 : f32
    %5 = vector.broadcast %cst : f32 to vector<8x128xf32>
    %6 = arith.index_cast %arg0 : i32 to index
    %c0 = arith.constant 0 : index
    %7 = memref.load %arg1[%6, %c0] : memref<1x8xi32, #tpu.memory_space<smem>>
    %c0_i32_1 = arith.constant 0 : i32
    %8 = vector.broadcast %c0_i32_1 : i32 to vector<8x128xi32>
    %9 = arith.cmpi eq, %3, %8 : vector<8x128xi32>
    %10 = vector.broadcast %7 : i32 to vector<8x128xi32>
    %11 = arith.cmpi eq, %4, %10 : vector<8x128xi32>
    %12 = arith.andi %9, %11 : vector<8x128xi1>
    %cst_2 = arith.constant 1.000000e+00 : f32
    %13 = vector.broadcast %cst_2 : f32 to vector<8x128xf32>
    %14 = arith.select %12, %13, %5 : vector<8x128xi1>, vector<8x128xf32>
    %15 = arith.index_cast %arg0 : i32 to index
    %c1 = arith.constant 1 : index
    %16 = memref.load %arg1[%15, %c1] : memref<1x8xi32, #tpu.memory_space<smem>>
    %c1_i32 = arith.constant 1 : i32
    %17 = vector.broadcast %c1_i32 : i32 to vector<8x128xi32>
    %18 = arith.cmpi eq, %3, %17 : vector<8x128xi32>
    %19 = vector.broadcast %16 : i32 to vector<8x128xi32>
    %20 = arith.cmpi eq, %4, %19 : vector<8x128xi32>
    %21 = arith.andi %18, %20 : vector<8x128xi1>
    %cst_3 = arith.constant 1.000000e+00 : f32
    %22 = vector.broadcast %cst_3 : f32 to vector<8x128xf32>
    %23 = arith.select %21, %22, %14 : vector<8x128xi1>, vector<8x128xf32>
    %24 = arith.index_cast %arg0 : i32 to index
    %c2 = arith.constant 2 : index
    %25 = memref.load %arg1[%24, %c2] : memref<1x8xi32, #tpu.memory_space<smem>>
    %c2_i32 = arith.constant 2 : i32
    %26 = vector.broadcast %c2_i32 : i32 to vector<8x128xi32>
    %27 = arith.cmpi eq, %3, %26 : vector<8x128xi32>
    %28 = vector.broadcast %25 : i32 to vector<8x128xi32>
    %29 = arith.cmpi eq, %4, %28 : vector<8x128xi32>
    %30 = arith.andi %27, %29 : vector<8x128xi1>
    %cst_4 = arith.constant 1.000000e+00 : f32
    %31 = vector.broadcast %cst_4 : f32 to vector<8x128xf32>
    %32 = arith.select %30, %31, %23 : vector<8x128xi1>, vector<8x128xf32>
    %33 = arith.index_cast %arg0 : i32 to index
    %c3 = arith.constant 3 : index
    %34 = memref.load %arg1[%33, %c3] : memref<1x8xi32, #tpu.memory_space<smem>>
    %c3_i32 = arith.constant 3 : i32
    %35 = vector.broadcast %c3_i32 : i32 to vector<8x128xi32>
    %36 = arith.cmpi eq, %3, %35 : vector<8x128xi32>
    %37 = vector.broadcast %34 : i32 to vector<8x128xi32>
    %38 = arith.cmpi eq, %4, %37 : vector<8x128xi32>
    %39 = arith.andi %36, %38 : vector<8x128xi1>
    %cst_5 = arith.constant 1.000000e+00 : f32
    %40 = vector.broadcast %cst_5 : f32 to vector<8x128xf32>
    %41 = arith.select %39, %40, %32 : vector<8x128xi1>, vector<8x128xf32>
    %42 = arith.index_cast %arg0 : i32 to index
    %c4 = arith.constant 4 : index
    %43 = memref.load %arg1[%42, %c4] : memref<1x8xi32, #tpu.memory_space<smem>>
    %c4_i32 = arith.constant 4 : i32
    %44 = vector.broadcast %c4_i32 : i32 to vector<8x128xi32>
    %45 = arith.cmpi eq, %3, %44 : vector<8x128xi32>
    %46 = vector.broadcast %43 : i32 to vector<8x128xi32>
    %47 = arith.cmpi eq, %4, %46 : vector<8x128xi32>
    %48 = arith.andi %45, %47 : vector<8x128xi1>
    %cst_6 = arith.constant 1.000000e+00 : f32
    %49 = vector.broadcast %cst_6 : f32 to vector<8x128xf32>
    %50 = arith.select %48, %49, %41 : vector<8x128xi1>, vector<8x128xf32>
    %51 = arith.index_cast %arg0 : i32 to index
    %c5 = arith.constant 5 : index
    %52 = memref.load %arg1[%51, %c5] : memref<1x8xi32, #tpu.memory_space<smem>>
    %c5_i32 = arith.constant 5 : i32
    %53 = vector.broadcast %c5_i32 : i32 to vector<8x128xi32>
    %54 = arith.cmpi eq, %3, %53 : vector<8x128xi32>
    %55 = vector.broadcast %52 : i32 to vector<8x128xi32>
    %56 = arith.cmpi eq, %4, %55 : vector<8x128xi32>
    %57 = arith.andi %54, %56 : vector<8x128xi1>
    %cst_7 = arith.constant 1.000000e+00 : f32
    %58 = vector.broadcast %cst_7 : f32 to vector<8x128xf32>
    %59 = arith.select %57, %58, %50 : vector<8x128xi1>, vector<8x128xf32>
    %60 = arith.index_cast %arg0 : i32 to index
    %c6 = arith.constant 6 : index
    %61 = memref.load %arg1[%60, %c6] : memref<1x8xi32, #tpu.memory_space<smem>>
    %c6_i32 = arith.constant 6 : i32
    %62 = vector.broadcast %c6_i32 : i32 to vector<8x128xi32>
    %63 = arith.cmpi eq, %3, %62 : vector<8x128xi32>
    %64 = vector.broadcast %61 : i32 to vector<8x128xi32>
    %65 = arith.cmpi eq, %4, %64 : vector<8x128xi32>
    %66 = arith.andi %63, %65 : vector<8x128xi1>
    %cst_8 = arith.constant 1.000000e+00 : f32
    %67 = vector.broadcast %cst_8 : f32 to vector<8x128xf32>
    %68 = arith.select %66, %67, %59 : vector<8x128xi1>, vector<8x128xf32>
    %69 = arith.index_cast %arg0 : i32 to index
    %c7 = arith.constant 7 : index
    %70 = memref.load %arg1[%69, %c7] : memref<1x8xi32, #tpu.memory_space<smem>>
    %c7_i32 = arith.constant 7 : i32
    %71 = vector.broadcast %c7_i32 : i32 to vector<8x128xi32>
    %72 = arith.cmpi eq, %3, %71 : vector<8x128xi32>
    %73 = vector.broadcast %70 : i32 to vector<8x128xi32>
    %74 = arith.cmpi eq, %4, %73 : vector<8x128xi32>
    %75 = arith.andi %72, %74 : vector<8x128xi1>
    %cst_9 = arith.constant 1.000000e+00 : f32
    %76 = vector.broadcast %cst_9 : f32 to vector<8x128xf32>
    %77 = arith.select %75, %76, %68 : vector<8x128xi1>, vector<8x128xf32>
    %c0_10 = arith.constant 0 : index
    %c0_11 = arith.constant 0 : index
    %78 = vector.load %arg2[%c0_10, %c0_11] : memref<128x64xf32, #tpu.memory_space<vmem>>, vector<128x64xf32>
    %cst_12 = arith.constant dense<0.000000e+00> : vector<8x64xf32>
    %79 = tpu.matmul %77, %78, %cst_12 {dimension_numbers = #tpu.dot_dimension_numbers<[1], [0], [0], [1], [0, 0, 1, 1], [], []>} : vector<8x128xf32>, vector<128x64xf32>, vector<8x64xf32> -> vector<8x64xf32>
    %c0_13 = arith.constant 0 : index
    %c0_14 = arith.constant 0 : index
    %c0_15 = arith.constant 0 : index
    %80 = vector.load %arg12[%c0_13, %c0_14, %c0_15] : memref<2x8x256xf32, #tpu.memory_space<vmem>>, vector<1x8x256xf32>
    %81 = vector.shape_cast %80 : vector<1x8x256xf32> to vector<8x256xf32>
    %c0_16 = arith.constant 0 : index
    %c0_17 = arith.constant 0 : index
    %c0_18 = arith.constant 0 : index
    %82 = vector.load %arg13[%c0_16, %c0_17, %c0_18] : memref<2x8x256xf32, #tpu.memory_space<vmem>>, vector<1x8x256xf32>
    %83 = vector.shape_cast %82 : vector<1x8x256xf32> to vector<8x256xf32>
    %84 = tpu.concatenate %81, %79 in 1 : vector<8x256xf32>, vector<8x64xf32> -> vector<8x320xf32>
    %c0_19 = arith.constant 0 : index
    %c0_20 = arith.constant 0 : index
    %85 = vector.load %arg5[%c0_19, %c0_20] : memref<320x1024xbf16, #tpu.memory_space<vmem>>, vector<320x1024xbf16>
    %86 = arith.extf %85 : vector<320x1024xbf16> to vector<320x1024xf32>
    %cst_21 = arith.constant dense<0.000000e+00> : vector<8x1024xf32>
    %87 = tpu.matmul %84, %86, %cst_21 {dimension_numbers = #tpu.dot_dimension_numbers<[1], [0], [0], [1], [0, 0, 1, 1], [], []>} : vector<8x320xf32>, vector<320x1024xf32>, vector<8x1024xf32> -> vector<8x1024xf32>
    %c0_22 = arith.constant 0 : index
    %c0_23 = arith.constant 0 : index
    %88 = vector.load %arg6[%c0_22, %c0_23] : memref<1x1024xf32, #tpu.memory_space<vmem>>, vector<1x1024xf32>
    %89 = vector.broadcast %88 : vector<1x1024xf32> to vector<8x1024xf32>
    %90 = arith.addf %87, %89 : vector<8x1024xf32>
    %91 = vector.extract_strided_slice %90 {offsets = [0, 0], sizes = [8, 256], strides = [1, 1]} : vector<8x1024xf32> to vector<8x256xf32>
    %92 = arith.negf %91 : vector<8x256xf32>
    %93 = math.exp %92 : vector<8x256xf32>
    %cst_24 = arith.constant 1.000000e+00 : f32
    %94 = vector.broadcast %cst_24 : f32 to vector<8x256xf32>
    %95 = arith.addf %94, %93 : vector<8x256xf32>
    %96 = arith.divf %94, %95 : vector<8x256xf32>
    %97 = vector.extract_strided_slice %90 {offsets = [0, 256], sizes = [8, 256], strides = [1, 1]} : vector<8x1024xf32> to vector<8x256xf32>
    %98 = arith.negf %97 : vector<8x256xf32>
    %99 = math.exp %98 : vector<8x256xf32>
    %cst_25 = arith.constant 1.000000e+00 : f32
    %100 = vector.broadcast %cst_25 : f32 to vector<8x256xf32>
    %101 = arith.addf %100, %99 : vector<8x256xf32>
    %102 = arith.divf %100, %101 : vector<8x256xf32>
    %103 = vector.extract_strided_slice %90 {offsets = [0, 512], sizes = [8, 256], strides = [1, 1]} : vector<8x1024xf32> to vector<8x256xf32>
    %104 = math.tanh %103 : vector<8x256xf32>
    %105 = vector.extract_strided_slice %90 {offsets = [0, 768], sizes = [8, 256], strides = [1, 1]} : vector<8x1024xf32> to vector<8x256xf32>
    %106 = arith.negf %105 : vector<8x256xf32>
    %107 = math.exp %106 : vector<8x256xf32>
    %cst_26 = arith.constant 1.000000e+00 : f32
    %108 = vector.broadcast %cst_26 : f32 to vector<8x256xf32>
    %109 = arith.addf %108, %107 : vector<8x256xf32>
    %110 = arith.divf %108, %109 : vector<8x256xf32>
    %111 = arith.mulf %102, %83 : vector<8x256xf32>
    %112 = arith.mulf %96, %104 : vector<8x256xf32>
    %113 = arith.addf %111, %112 : vector<8x256xf32>
    %114 = math.tanh %113 : vector<8x256xf32>
    %115 = arith.mulf %110, %114 : vector<8x256xf32>
    %c1_27 = arith.constant 1 : index
    %c0_28 = arith.constant 0 : index
    %c0_29 = arith.constant 0 : index
    %116 = vector.load %arg12[%c1_27, %c0_28, %c0_29] : memref<2x8x256xf32, #tpu.memory_space<vmem>>, vector<1x8x256xf32>
    %117 = vector.shape_cast %116 : vector<1x8x256xf32> to vector<8x256xf32>
    %c1_30 = arith.constant 1 : index
    %c0_31 = arith.constant 0 : index
    %c0_32 = arith.constant 0 : index
    %118 = vector.load %arg13[%c1_30, %c0_31, %c0_32] : memref<2x8x256xf32, #tpu.memory_space<vmem>>, vector<1x8x256xf32>
    %119 = vector.shape_cast %118 : vector<1x8x256xf32> to vector<8x256xf32>
    %120 = tpu.concatenate %117, %115 in 1 : vector<8x256xf32>, vector<8x256xf32> -> vector<8x512xf32>
    %c0_33 = arith.constant 0 : index
    %c0_34 = arith.constant 0 : index
    %121 = vector.load %arg7[%c0_33, %c0_34] : memref<512x1024xbf16, #tpu.memory_space<vmem>>, vector<512x1024xbf16>
    %122 = arith.extf %121 : vector<512x1024xbf16> to vector<512x1024xf32>
    %cst_35 = arith.constant dense<0.000000e+00> : vector<8x1024xf32>
    %123 = tpu.matmul %120, %122, %cst_35 {dimension_numbers = #tpu.dot_dimension_numbers<[1], [0], [0], [1], [0, 0, 1, 1], [], []>} : vector<8x512xf32>, vector<512x1024xf32>, vector<8x1024xf32> -> vector<8x1024xf32>
    %c0_36 = arith.constant 0 : index
    %c0_37 = arith.constant 0 : index
    %124 = vector.load %arg8[%c0_36, %c0_37] : memref<1x1024xf32, #tpu.memory_space<vmem>>, vector<1x1024xf32>
    %125 = vector.broadcast %124 : vector<1x1024xf32> to vector<8x1024xf32>
    %126 = arith.addf %123, %125 : vector<8x1024xf32>
    %127 = vector.extract_strided_slice %126 {offsets = [0, 0], sizes = [8, 256], strides = [1, 1]} : vector<8x1024xf32> to vector<8x256xf32>
    %128 = arith.negf %127 : vector<8x256xf32>
    %129 = math.exp %128 : vector<8x256xf32>
    %cst_38 = arith.constant 1.000000e+00 : f32
    %130 = vector.broadcast %cst_38 : f32 to vector<8x256xf32>
    %131 = arith.addf %130, %129 : vector<8x256xf32>
    %132 = arith.divf %130, %131 : vector<8x256xf32>
    %133 = vector.extract_strided_slice %126 {offsets = [0, 256], sizes = [8, 256], strides = [1, 1]} : vector<8x1024xf32> to vector<8x256xf32>
    %134 = arith.negf %133 : vector<8x256xf32>
    %135 = math.exp %134 : vector<8x256xf32>
    %cst_39 = arith.constant 1.000000e+00 : f32
    %136 = vector.broadcast %cst_39 : f32 to vector<8x256xf32>
    %137 = arith.addf %136, %135 : vector<8x256xf32>
    %138 = arith.divf %136, %137 : vector<8x256xf32>
    %139 = vector.extract_strided_slice %126 {offsets = [0, 512], sizes = [8, 256], strides = [1, 1]} : vector<8x1024xf32> to vector<8x256xf32>
    %140 = math.tanh %139 : vector<8x256xf32>
    %141 = vector.extract_strided_slice %126 {offsets = [0, 768], sizes = [8, 256], strides = [1, 1]} : vector<8x1024xf32> to vector<8x256xf32>
    %142 = arith.negf %141 : vector<8x256xf32>
    %143 = math.exp %142 : vector<8x256xf32>
    %cst_40 = arith.constant 1.000000e+00 : f32
    %144 = vector.broadcast %cst_40 : f32 to vector<8x256xf32>
    %145 = arith.addf %144, %143 : vector<8x256xf32>
    %146 = arith.divf %144, %145 : vector<8x256xf32>
    %147 = arith.mulf %138, %119 : vector<8x256xf32>
    %148 = arith.mulf %132, %140 : vector<8x256xf32>
    %149 = arith.addf %147, %148 : vector<8x256xf32>
    %150 = math.tanh %149 : vector<8x256xf32>
    %151 = arith.mulf %146, %150 : vector<8x256xf32>
    %c0_41 = arith.constant 0 : index
    %c0_42 = arith.constant 0 : index
    %152 = vector.load %arg9[%c0_41, %c0_42] : memref<256x128xbf16, #tpu.memory_space<vmem>>, vector<256x128xbf16>
    %153 = arith.extf %152 : vector<256x128xbf16> to vector<256x128xf32>
    %cst_43 = arith.constant dense<0.000000e+00> : vector<8x128xf32>
    %154 = tpu.matmul %151, %153, %cst_43 {dimension_numbers = #tpu.dot_dimension_numbers<[1], [0], [0], [1], [0, 0, 1, 1], [], []>} : vector<8x256xf32>, vector<256x128xf32>, vector<8x128xf32> -> vector<8x128xf32>
    %c0_44 = arith.constant 0 : index
    %c0_45 = arith.constant 0 : index
    %155 = vector.load %arg10[%c0_44, %c0_45] : memref<1x128xf32, #tpu.memory_space<vmem>>, vector<1x128xf32>
    %156 = vector.broadcast %155 : vector<1x128xf32> to vector<8x128xf32>
    %157 = arith.addf %154, %156 : vector<8x128xf32>
    %c0_46 = arith.constant 0 : index
    %c0_47 = arith.constant 0 : index
    %c0_48 = arith.constant 0 : index
    %158 = vector.load %arg11[%c0_46, %c0_47, %c0_48] : memref<1x8x128xf32, #tpu.memory_space<vmem>>, vector<1x8x128xf32>
    %159 = vector.shape_cast %158 : vector<1x8x128xf32> to vector<8x128xf32>
    %160 = vector.shape_cast %157 : vector<8x128xf32> to vector<1x8x128xf32>
    tpu.vector_store %arg11[%c0_46, %c0_47, %c0_48], %160 {strides = array<i32>} : memref<1x8x128xf32, #tpu.memory_space<vmem>>, vector<1x8x128xf32>,
    %c0_49 = arith.constant 0 : index
    %c0_50 = arith.constant 0 : index
    %c0_51 = arith.constant 0 : index
    %161 = vector.load %arg12[%c0_49, %c0_50, %c0_51] : memref<2x8x256xf32, #tpu.memory_space<vmem>>, vector<1x8x256xf32>
    %162 = vector.shape_cast %161 : vector<1x8x256xf32> to vector<8x256xf32>
    %163 = vector.shape_cast %115 : vector<8x256xf32> to vector<1x8x256xf32>
    tpu.vector_store %arg12[%c0_49, %c0_50, %c0_51], %163 {strides = array<i32>} : memref<2x8x256xf32, #tpu.memory_space<vmem>>, vector<1x8x256xf32>,
    %c0_52 = arith.constant 0 : index
    %c0_53 = arith.constant 0 : index
    %c0_54 = arith.constant 0 : index
    %164 = vector.load %arg13[%c0_52, %c0_53, %c0_54] : memref<2x8x256xf32, #tpu.memory_space<vmem>>, vector<1x8x256xf32>
    %165 = vector.shape_cast %164 : vector<1x8x256xf32> to vector<8x256xf32>
    %166 = vector.shape_cast %113 : vector<8x256xf32> to vector<1x8x256xf32>
    tpu.vector_store %arg13[%c0_52, %c0_53, %c0_54], %166 {strides = array<i32>} : memref<2x8x256xf32, #tpu.memory_space<vmem>>, vector<1x8x256xf32>,
    %c1_55 = arith.constant 1 : index
    %c0_56 = arith.constant 0 : index
    %c0_57 = arith.constant 0 : index
    %167 = vector.load %arg12[%c1_55, %c0_56, %c0_57] : memref<2x8x256xf32, #tpu.memory_space<vmem>>, vector<1x8x256xf32>
    %168 = vector.shape_cast %167 : vector<1x8x256xf32> to vector<8x256xf32>
    %169 = vector.shape_cast %151 : vector<8x256xf32> to vector<1x8x256xf32>
    tpu.vector_store %arg12[%c1_55, %c0_56, %c0_57], %169 {strides = array<i32>} : memref<2x8x256xf32, #tpu.memory_space<vmem>>, vector<1x8x256xf32>,
    %c1_58 = arith.constant 1 : index
    %c0_59 = arith.constant 0 : index
    %c0_60 = arith.constant 0 : index
    %170 = vector.load %arg13[%c1_58, %c0_59, %c0_60] : memref<2x8x256xf32, #tpu.memory_space<vmem>>, vector<1x8x256xf32>
    %171 = vector.shape_cast %170 : vector<1x8x256xf32> to vector<8x256xf32>
    %172 = vector.shape_cast %149 : vector<8x256xf32> to vector<1x8x256xf32>
    tpu.vector_store %arg13[%c1_58, %c0_59, %c0_60], %172 {strides = array<i32>} : memref<2x8x256xf32, #tpu.memory_space<vmem>>, vector<1x8x256xf32>,
    return
  }
  func.func @transform_0(%arg0: i32, %arg1: memref<1x8xi32, #tpu.memory_space<smem>>) -> (i32, i32) {
    %c0_i32 = arith.constant 0 : i32
    %c0_i32_0 = arith.constant 0 : i32
    %c0_i32_1 = arith.constant 0 : i32
    return %c0_i32, %c0_i32_0 : i32, i32
  }
  func.func @transform_1(%arg0: i32, %arg1: memref<1x8xi32, #tpu.memory_space<smem>>) -> (i32, i32, i32) {
    %c0_i32 = arith.constant 0 : i32
    %c0_i32_0 = arith.constant 0 : i32
    %c0_i32_1 = arith.constant 0 : i32
    %c0_i32_2 = arith.constant 0 : i32
    return %c0_i32, %c0_i32_0, %c0_i32_1 : i32, i32, i32
  }
  func.func @transform_2(%arg0: i32, %arg1: memref<1x8xi32, #tpu.memory_space<smem>>) -> (i32, i32, i32) {
    %c0_i32 = arith.constant 0 : i32
    %c0_i32_0 = arith.constant 0 : i32
    %c0_i32_1 = arith.constant 0 : i32
    %c0_i32_2 = arith.constant 0 : i32
    return %c0_i32, %c0_i32_0, %c0_i32_1 : i32, i32, i32
  }
  func.func @transform_3(%arg0: i32, %arg1: memref<1x8xi32, #tpu.memory_space<smem>>) -> (i32, i32) {
    %c0_i32 = arith.constant 0 : i32
    %c0_i32_0 = arith.constant 0 : i32
    %c0_i32_1 = arith.constant 0 : i32
    return %c0_i32, %c0_i32_0 : i32, i32
  }
  func.func @transform_4(%arg0: i32, %arg1: memref<1x8xi32, #tpu.memory_space<smem>>) -> (i32, i32) {
    %c0_i32 = arith.constant 0 : i32
    %c0_i32_0 = arith.constant 0 : i32
    %c0_i32_1 = arith.constant 0 : i32
    return %c0_i32, %c0_i32_0 : i32, i32
  }
  func.func @transform_5(%arg0: i32, %arg1: memref<1x8xi32, #tpu.memory_space<smem>>) -> (i32, i32) {
    %c0_i32 = arith.constant 0 : i32
    %c0_i32_0 = arith.constant 0 : i32
    %c0_i32_1 = arith.constant 0 : i32
    return %c0_i32, %c0_i32_0 : i32, i32
  }
  func.func @transform_6(%arg0: i32, %arg1: memref<1x8xi32, #tpu.memory_space<smem>>) -> (i32, i32) {
    %c0_i32 = arith.constant 0 : i32
    %c0_i32_0 = arith.constant 0 : i32
    %c0_i32_1 = arith.constant 0 : i32
    return %c0_i32, %c0_i32_0 : i32, i32
  }
  func.func @transform_7(%arg0: i32, %arg1: memref<1x8xi32, #tpu.memory_space<smem>>) -> (i32, i32) {
    %c0_i32 = arith.constant 0 : i32
    %c0_i32_0 = arith.constant 0 : i32
    %c0_i32_1 = arith.constant 0 : i32
    return %c0_i32, %c0_i32_0 : i32, i32
  }
  func.func @transform_8(%arg0: i32, %arg1: memref<1x8xi32, #tpu.memory_space<smem>>) -> (i32, i32) {
    %c0_i32 = arith.constant 0 : i32
    %c0_i32_0 = arith.constant 0 : i32
    %c0_i32_1 = arith.constant 0 : i32
    return %c0_i32, %c0_i32_0 : i32, i32
  }
  func.func @transform_9(%arg0: i32, %arg1: memref<1x8xi32, #tpu.memory_space<smem>>) -> (i32, i32, i32) {
    %c0_i32 = arith.constant 0 : i32
    %c0_i32_0 = arith.constant 0 : i32
    %c0_i32_1 = arith.constant 0 : i32
    return %arg0, %c0_i32, %c0_i32_0 : i32, i32, i32
  }
  func.func @transform_10(%arg0: i32, %arg1: memref<1x8xi32, #tpu.memory_space<smem>>) -> (i32, i32, i32) {
    %c0_i32 = arith.constant 0 : i32
    %c0_i32_0 = arith.constant 0 : i32
    %c0_i32_1 = arith.constant 0 : i32
    %c0_i32_2 = arith.constant 0 : i32
    return %c0_i32, %c0_i32_0, %c0_i32_1 : i32, i32, i32
  }
  func.func @transform_11(%arg0: i32, %arg1: memref<1x8xi32, #tpu.memory_space<smem>>) -> (i32, i32, i32) {
    %c0_i32 = arith.constant 0 : i32
    %c0_i32_0 = arith.constant 0 : i32
    %c0_i32_1 = arith.constant 0 : i32
    %c0_i32_2 = arith.constant 0 : i32
    return %c0_i32, %c0_i32_0, %c0_i32_1 : i32, i32, i32
  }
}

</mosaic_0001>

<bundles_post_ra>
// kernel: decoder_decode.1
= control target key start
LH: loop header
LB: loop body
LE: loop exit
PB: predicated region body
PF: predicated region fallthrough
CT: control target
= control target key end

     0   :  { %s5108_s0 = inlined_call_operand.vmem [shape: s32[1,8], index: 0, kind: input, shape index: {}]   ;;  %s5109_s1 = inlined_call_operand.vmem [shape: f32[128,64], index: 1, kind: input, shape index: {}]   ;;  %s5110_s2 = inlined_call_operand.vmem [shape: f32[2,8,256], index: 2, kind: input, shape index: {}]   ;;  %s5111_s3 = inlined_call_operand.vmem [shape: f32[2,8,256], index: 3, kind: input, shape index: {}]   ;;  %s5112_s4 = inlined_call_operand.hbm [shape: bf16[320,1024], index: 4, kind: input, shape index: {}]   ;;  %s5113_s5 = inlined_call_operand.vmem [shape: f32[1,1024], index: 5, kind: input, shape index: {}]   ;;  %s5114_s6 = inlined_call_operand.hbm [shape: bf16[512,1024], index: 6, kind: input, shape index: {}]   ;;  %s5115_s7 = inlined_call_operand.vmem [shape: f32[1,1024], index: 7, kind: input, shape index: {}]   ;;  %s5116_s8 = inlined_call_operand.vmem [shape: bf16[256,128], index: 8, kind: input, shape index: {}]   ;;  %s5117_s9 = inlined_call_operand.vmem [shape: f32[1,128], index: 9, kind: input, shape index: {}]   ;;  %s5118_s10 = inlined_call_operand.vmem [shape: f32[1,8,128], index: 10, kind: output, shape index: {0}]   ;;  %s5119_s11 = inlined_call_operand.vmem [shape: f32[2,8,256], index: 11, kind: output, shape index: {1}]   ;;  %s5120_s12 = inlined_call_operand.vmem [shape: f32[2,8,256], index: 12, kind: output, shape index: {2}]  }
   0x1   :  { %s18_s23 = sshll.u32 %s5108_s0, 4  ;;  %s19_s23 = int_to_ptr.vmem [resolvable:$true] %s18_s23 }
   0x2   :  { %s4584_s24 = scalar_lea.vmem %s19_s23, 16  ;;  %p4589_p1 = scmp.lt.s32.totalorder %s19_s23, %s19_s23 }
   0x3   :  { %p4585_p0 = scmp.ne.s32.totalorder %s19_s23, %s4584_s24  ;;  %p4590_p2 = scmp.lt.s32.totalorder %s4584_s24, %s4584_s24 }
   0x5   :  { %p4591_p3 = por %p4590_p2, %p4589_p1 }
   0x7   :  { %p4592_p4 = pnand %p4591_p3, %p4585_p0 }
   0x9   :  { %4595 = shalt.err (!%p4592_p4)  }
   0xa   :  { %s4646_s25 = smov [#allocation3]  }
   0xb   :  { %21 = dma.vmem_to_smem %s19_s23, 16, %s4646_s25, [#allocation2] }
   0xc   :  { %4640 = dma.done.wait [#allocation2], 16 }
   0xd   :  { %4641 = vsyncadd [#allocation2], 4294967280 }
   0xe   :  { %23 = sfence }
   0xf   :  { %24 = vsyncpa [#allocation5], 0 }
  0x10   :  { %25 = vsyncpa [#allocation7], 0  ;;  %s4647_s26 = smov [#allocation4]   ;;  %s4596_s29 = scalar_lea.hbm %s5112_s4, 20480 }
  0x11   :  { %s37_s27 = sshll.u32 %s4647_s26, 4  ;;  %p4597_p5 = scmp.ne.s32.totalorder %s5112_s4, %s4596_s29  ;;  %s38_s27 = int_to_ptr.vmem [resolvable:$true] %s37_s27 }
  0x12   :  { %p4600_p6 = scmp.lt.u32.totalorder %s4596_s29, %s5112_s4 }
  0x14   :  { %p4602_p7 = pnand %p4600_p6, %p4597_p5 }
  0x16   :  { %4605 = shalt.err (!%p4602_p7)
}
  0x17   :  { %s4606_s16 = scalar_lea.vmem %s38_s27, 20480  ;;  %p4611_p9 = scmp.lt.s32.totalorder %s38_s27, %s38_s27 }
  0x18   :  { %p4607_p8 = scmp.ne.s32.totalorder %s38_s27, %s4606_s16  ;;  %p4612_p10 = scmp.lt.s32.totalorder %s4606_s16, %s4606_s16 }
  0x1a   :  { %p4613_p11 = por %p4612_p10, %p4611_p9 }
  0x1c   :  { %p4614_p12 = pnand %p4613_p11, %p4607_p8 }
  0x1e   :  { %4617 = shalt.err (!%p4614_p12)
}
  0x1f   :  { %s4648_s17 = smov 512   ;;  %s4649_s18 = smov 32  }
  0x20   :  { %43 = dma.hbm_to_vmem [thread:$0]  %s5112_s4, 20480, %s38_s27, [#allocation5], %s4648_s17, %s4648_s17, %s4649_s18  }
  0x21   :  { %s4650_s21 = smov [#allocation6]   ;;  %s4618_s25 = scalar_lea.hbm %s5114_s6, 32768 }
  0x22   :  { %s51_s22 = sshll.u32 %s4650_s21, 4  ;;  %p4619_p13 = scmp.ne.s32.totalorder %s5114_s6, %s4618_s25  ;;  %s52_s22 = int_to_ptr.vmem [resolvable:$true] %s51_s22 }
  0x23   :  { %p4622_p0 = scmp.lt.u32.totalorder %s4618_s25, %s5114_s6 }
  0x25   :  { %p4624_p1 = pnand %p4622_p0, %p4619_p13 }
  0x27   :  { %4627 = shalt.err (!%p4624_p1)
}
  0x28   :  { %s4628_s30 = scalar_lea.vmem %s52_s22, 32768  ;;  %p4633_p3 = scmp.lt.s32.totalorder %s52_s22, %s52_s22 }
  0x29   :  { %p4629_p2 = scmp.ne.s32.totalorder %s52_s22, %s4628_s30  ;;  %p4634_p4 = scmp.lt.s32.totalorder %s4628_s30, %s4628_s30 }
  0x2b   :  { %p4635_p5 = por %p4634_p4, %p4633_p3 }
  0x2d   :  { %p4636_p6 = pnand %p4635_p5, %p4629_p2 }
  0x2f   :  { %4639 = shalt.err (!%p4636_p6)
}
  0x30   :  { %57 = dma.hbm_to_vmem [thread:$0]  %s5114_s6, 32768, %s52_s22, [#allocation7], %s4648_s17, %s4648_s17, %s4649_s18  }
  0x31   :  { %4642 = dma.done.wait [#allocation5], 20480  }
  0x32   :  { %4643 = vsyncadd [#allocation5], 4294946816 }
  0x33   :  { %4644 = dma.done.wait [#allocation7], 32768  }
  0x34   :  { %4645 = vsyncadd [#allocation7], 4294934528  ;;  %v4651_v0 = vmov 0.0|0.0   ;;  %vm4652_vm0 = vmmov 0   ;;  %v4653_v1 = vmov 0.0   ;;  %s95_s13 = sld [smem:[#allocation3]]  ;;  %v90_v2 = vlaneseq }
  0x35   :  { %3176 = vmatprep.subr.bf16.mxu0 %v4651_v0  ;;  %3173 = vmatprep.mubr.msk.f32.mxu0 %vm4652_vm0, %v4653_v1  ;;  %s2978_s14 = sld [smem:[#allocation3 + $0x1]]  ;;  %s4748_s15 = sld [smem:[#allocation3 + $0x2]]  ;;  %v150_v3 = vld [vmem:[%s5109_s1] sm:$0xff]  ;;  %v151_v4 = vld [vmem:[%s5109_s1 + $0x8] sm:$0xff]  ;;  %v152_v5 = vld [vmem:[%s5109_s1 + $0x10] sm:$0xff] }
  0x36   :  { %v4759_v6 = vshrl.u32 %v90_v2, 7  ;;  %v4761_v7 = vand.u32 127, %v90_v2  ;;  %v3177_v8 = vpack.c.bf16 %v151_v4, %v150_v3  ;;  %v153_v9 = vld [vmem:[%s5109_s1 + $0x18] sm:$0xff]  ;;  %s4766_s23 = sld [smem:[#allocation3 + $0x3]]  ;;  %v154_v12 = vld [vmem:[%s5109_s1 + $0x20] sm:$0xff]  ;;  %v155_v13 = vld [vmem:[%s5109_s1 + $0x28] sm:$0xff] }
  0x37   :  { %v3180_v11 = vpack.c.bf16 %v153_v9, %v152_v5  ;;  %s4777_s0 = sld [smem:[#allocation3 + $0x4]]  ;;  %v240_v15 = vld [vmem:[#allocation4] sm:$0xff]  ;;  %v3183_v16 = vpack.c.bf16 %v155_v13, %v154_v12  ;;  %v156_v23 = vld [vmem:[%s5109_s1 + $0x30] sm:$0xff]  ;;  %v157_v24 = vld [vmem:[%s5109_s1 + $0x38] sm:$0xff]  ;;  %s4814_s16 = sld [smem:[#allocation3 + $0x6]] }
  0x38   :  { %3178 = vmatpush3.bf16.msra.mxu0 %v3177_v8  ;;  %vm96_vm1 = vcmp.eq.s32.totalorder %v4759_v6, 0  ;;  %vm103_vm3 = vcmp.eq.s32.totalorder %v4759_v6, 1  ;;  %v244_v17 = vld [vmem:[#allocation4 + $0x20] sm:$0xff]  ;;  %vm110_vm6 = vcmp.eq.s32.totalorder %v4759_v6, 2  ;;  %v3186_v34 = vpack.c.bf16 %v157_v24, %v156_v23  ;;  %v159_v37 = vld [vmem:[%s5109_s1 + $0x48] sm:$0xff]  ;;  %s4829_s17 = sld [smem:[#allocation3 + $0x7]] }
  0x39   :  { %3179 = vmatprep.subr.bf16.mxu0 %v4651_v0  ;;  %v4096_v20 = vcombine.high %v240_v15, %v244_v17  ;;  %v4097_v21 = vcombine.low %v240_v15, %v244_v17  ;;  %v248_v22 = vld [vmem:[#allocation4 + $0x40] sm:$0xff]  ;;  %vm117_vm10 = vcmp.eq.s32.totalorder %v4759_v6, 3  ;;  %v160_v44 = vld [vmem:[%s5109_s1 + $0x50] sm:$0xff]  ;;  %v161_v45 = vld [vmem:[%s5109_s1 + $0x58] sm:$0xff]  ;;  %vm124_vm13 = vcmp.eq.s32.totalorder %v4759_v6, 4 }
  0x3a   :  { %v97_v10 = vstv %s95_s13  ;;  %s4793_s13 = sld [smem:[#allocation3 + $0x5]]  ;;  %v252_v25 = vld [vmem:[#allocation4 + $0x60] sm:$0xff]  ;;  %v3192_v52 = vpack.c.bf16 %v161_v45, %v160_v44  ;;  %vm131_vm15 = vcmp.eq.s32.totalorder %v4759_v6, 5  ;;  %v163_v58 = vld [vmem:[%s5109_s1 + $0x68] sm:$0xff]  ;;  %v164_v4 = vld [vmem:[%s5109_s1 + $0x70] sm:$0xff] }
  0x3b   :  { %vm98_vm2 = vcmp.eq.s32.totalorder %v4761_v7, %v97_v10  ;;  %v104_v14 = vstv %s2978_s14  ;;  %v111_v19 = vstv %s4748_s15  ;;  %3201 = vmatprep.subr.bf16.mxu1 %v4096_v20  ;;  %v4098_v26 = vcombine.high %v248_v22, %v252_v25  ;;  %v256_v27 = vld [vmem:[#allocation4 + $0x80] sm:$0xff]  ;;  %v165_v8 = vld [vmem:[%s5109_s1 + $0x78] sm:$0xff]  ;;  %v241_v12 = vld [vmem:[#allocation4 + $0x8] sm:$0xff] }
  0x3c   :  { %3181 = vmatpush3.bf16.msra.mxu0 %v3180_v11  ;;  %vm99_vm4 = vmand %vm96_vm1, %vm98_vm2  ;;  %vm4781_vm5 = vcmp.eq.s32.totalorder %v4761_v7, %v104_v14  ;;  %vm4806_vm8 = vcmp.eq.s32.totalorder %v4761_v7, %v111_v19  ;;  %v118_v31 = vstv %s4766_s23  ;;  %3203 = vmatpush1.bf16.msra.mxu1 %v4097_v21  ;;  %v4099_v32 = vcombine.low %v248_v22, %v252_v25  ;;  %v260_v33 = vld [vmem:[#allocation4 + $0xa0] sm:$0xff]  ;;  %v245_v13 = vld [vmem:[#allocation4 + $0x28] sm:$0xff] }
  0x3d   :  { %3182 = vmatprep.subr.bf16.mxu0 %v4651_v0  ;;  %v100_v28 = vsel %vm99_vm4, 1.0, %v4653_v1  ;;  %vm4801_vm7 = vmand %vm103_vm3, %vm4781_vm5  ;;  %v158_v35 = vld [vmem:[%s5109_s1 + $0x40] sm:$0xff]  ;;  %3205 = vmatprep.subr.bf16.mxu1 %v4098_v26  ;;  %v4100_v36 = vcombine.high %v256_v27, %v260_v33  ;;  %vm119_vm11 = vcmp.eq.s32.totalorder %v4761_v7, %v118_v31  ;;  %v125_v41 = vstv %s4777_s0  ;;  %v249_v22 = vld [vmem:[#allocation4 + $0x48] sm:$0xff] }
  0x3e   :  { %v264_v38 = vld [vmem:[#allocation4 + $0xc0] sm:$0xff]  ;;  %v107_v40 = vsel %vm4801_vm7, 1.0, %v100_v28  ;;  %vm113_vm9 = vmand %vm110_vm6, %vm4806_vm8  ;;  %v4101_v42 = vcombine.low %v256_v27, %v260_v33  ;;  %v3189_v43 = vpack.c.bf16 %v159_v37, %v158_v35  ;;  %vm126_vm14 = vcmp.eq.s32.totalorder %v4761_v7, %v125_v41  ;;  %v4887_v23 = vld [vmem:[%s5110_s2 + $0x8] sm:$0xff] }
  0x3f   :  { %v268_v39 = vld [vmem:[#allocation4 + $0xe0] sm:$0xff]  ;;  %v114_v47 = vsel %vm113_vm9, 1.0, %v107_v40  ;;  %vm4838_vm12 = vmand %vm117_vm10, %vm119_vm11  ;;  %v139_v56 = vstv %s4814_s16  ;;  %vm138_vm2 = vcmp.eq.s32.totalorder %v4759_v6, 6  ;;  %v146_v63 = vstv %s4829_s17  ;;  %830 = vmatprep.mubr.f32.mxu1 %v4887_v23  ;;  %v257_v30 = vld [vmem:[#allocation4 + $0x88] sm:$0xff] }
  0x40   :  { %3184 = vmatpush3.bf16.msra.mxu0 %v3183_v16  ;;  %3207 = vmatpush1.bf16.msra.mxu1 %v4099_v32  ;;  %v4102_v46 = vcombine.high %v264_v38, %v268_v39  ;;  %v132_v49 = vstv %s4793_s13  ;;  %v272_v50 = vld [vmem:[#allocation4 + $0x100] sm:$0xff]  ;;  %v4103_v53 = vcombine.low %v264_v38, %v268_v39  ;;  %v121_v55 = vsel %vm4838_vm12, 1.0, %v114_v47  ;;  %vm127_vm0 = vmand %vm124_vm13, %vm126_vm14  ;;  %v261_v31 = vld [vmem:[#allocation4 + $0xa8] sm:$0xff] }
  0x41   :  { %3185 = vmatprep.subr.bf16.mxu0 %v4651_v0  ;;  %3209 = vmatprep.subr.bf16.mxu1 %v4100_v36  ;;  %v276_v51 = vld [vmem:[#allocation4 + $0x120] sm:$0xff]  ;;  %vm133_vm1 = vcmp.eq.s32.totalorder %v4761_v7, %v132_v49  ;;  %v128_v61 = vsel %vm127_vm0, 1.0, %v121_v55  ;;  %vm140_vm4 = vcmp.eq.s32.totalorder %v4761_v7, %v139_v56  ;;  %vm145_vm6 = vcmp.eq.s32.totalorder %v4759_v6, 7  ;;  %v265_v38 = vld [vmem:[#allocation4 + $0xc8] sm:$0xff] }
  0x42   :  { %v162_v54 = vld [vmem:[%s5109_s1 + $0x60] sm:$0xff]  ;;  %v4104_v57 = vcombine.high %v272_v50, %v276_v51  ;;  %vm4860_vm3 = vmand %vm131_vm15, %vm133_vm1  ;;  %v4105_v2 = vcombine.low %v272_v50, %v276_v51  ;;  %vm147_vm7 = vcmp.eq.s32.totalorder %v4761_v7, %v146_v63  ;;  %v3198_v15 = vpack.c.bf16 %v165_v8, %v164_v4  ;;  %v253_v7 = vld [vmem:[#allocation4 + $0x68] sm:$0xff] }
  0x43   :  { %v280_v59 = vld [vmem:[#allocation4 + $0x140] sm:$0xff]  ;;  %v3195_v3 = vpack.c.bf16 %v163_v58, %v162_v54  ;;  %v135_v11 = vsel %vm4860_vm3, 1.0, %v128_v61  ;;  %vm141_vm5 = vmand %vm138_vm2, %vm140_vm4  ;;  %v4136_v19 = vcombine.high %v241_v12, %v245_v13  ;;  %v4137_v25 = vcombine.low %v241_v12, %v245_v13  ;;  %v269_v39 = vld [vmem:[#allocation4 + $0xe8] sm:$0xff] }
  0x44   :  { %3187 = vmatpush3.bf16.msra.mxu0 %v3186_v34  ;;  %3211 = vmatpush1.bf16.msra.mxu1 %v4101_v42  ;;  %v284_v60 = vld [vmem:[#allocation4 + $0x160] sm:$0xff]  ;;  %v142_v17 = vsel %vm141_vm5, 1.0, %v135_v11  ;;  %vm4880_vm8 = vmand %vm145_vm6, %vm147_vm7  ;;  %v4138_v27 = vcombine.high %v249_v22, %v253_v7  ;;  %v4139_v33 = vcombine.low %v249_v22, %v253_v7  ;;  %v4140_v35 = vcombine.high %v257_v30, %v261_v31  ;;  %v277_v47 = vld [vmem:[#allocation4 + $0x128] sm:$0xff] }
  0x45   :  { %3188 = vmatprep.subr.bf16.mxu0 %v4651_v0  ;;  %3213 = vmatprep.subr.bf16.mxu1 %v4102_v46  ;;  %v4106_v5 = vcombine.high %v280_v59, %v284_v60  ;;  %v288_v9 = vld [vmem:[#allocation4 + $0x180] sm:$0xff]  ;;  %v4107_v14 = vcombine.low %v280_v59, %v284_v60  ;;  %v4141_v41 = vcombine.low %v257_v30, %v261_v31  ;;  %v273_v46 = vld [vmem:[#allocation4 + $0x108] sm:$0xff]  ;;  %vm762_vm9 = vcmask 523264  }
  0x46   :  { %v292_v10 = vld [vmem:[#allocation4 + $0x1a0] sm:$0xff]  ;;  %v4143_v49 = vcombine.low %v265_v38, %v269_v39  ;;  %v4144_v51 = vcombine.high %v273_v46, %v277_v47  ;;  %v281_v54 = vld [vmem:[#allocation4 + $0x148] sm:$0xff] }
  0x47   :  { %v4108_v16 = vcombine.high %v288_v9, %v292_v10  ;;  %v296_v20 = vld [vmem:[#allocation4 + $0x1c0] sm:$0xff]  ;;  %v4109_v24 = vcombine.low %v288_v9, %v292_v10  ;;  %v285_v55 = vld [vmem:[#allocation4 + $0x168] sm:$0xff] }
  0x48   :  { %3190 = vmatpush3.bf16.msra.mxu0 %v3189_v43  ;;  %3215 = vmatpush1.bf16.msra.mxu1 %v4103_v53  ;;  %v300_v21 = vld [vmem:[#allocation4 + $0x1e0] sm:$0xff]  ;;  %v4142_v43 = vcombine.high %v265_v38, %v269_v39  ;;  %v4146_v59 = vcombine.high %v281_v54, %v285_v55  ;;  %v289_v62 = vld [vmem:[#allocation4 + $0x188] sm:$0xff] }
  0x49   :  { %3191 = vmatprep.subr.bf16.mxu0 %v4651_v0  ;;  %3217 = vmatprep.subr.bf16.mxu1 %v4104_v57  ;;  %v4110_v26 = vcombine.high %v296_v20, %v300_v21  ;;  %v304_v28 = vld [vmem:[#allocation4 + $0x200] sm:$0xff]  ;;  %v4111_v32 = vcombine.low %v296_v20, %v300_v21  ;;  %v4145_v57 = vcombine.low %v273_v46, %v277_v47  ;;  %v293_v63 = vld [vmem:[#allocation4 + $0x1a8] sm:$0xff] }
  0x4a   :  { %v308_v29 = vld [vmem:[#allocation4 + $0x220] sm:$0xff]  ;;  %v297_v10 = vld [vmem:[#allocation4 + $0x1c8] sm:$0xff]  ;;  %v4149_v13 = vcombine.low %v289_v62, %v293_v63 }
  0x4b   :  { %v4112_v34 = vcombine.high %v304_v28, %v308_v29  ;;  %v312_v36 = vld [vmem:[#allocation4 + $0x240] sm:$0xff]  ;;  %v4113_v40 = vcombine.low %v304_v28, %v308_v29  ;;  %v301_v11 = vld [vmem:[#allocation4 + $0x1e8] sm:$0xff] }
  0x4c   :  { %3193 = vmatpush3.bf16.msra.mxu0 %v3192_v52  ;;  %3219 = vmatpush1.bf16.msra.mxu1 %v4105_v2  ;;  %v316_v37 = vld [vmem:[#allocation4 + $0x260] sm:$0xff]  ;;  %v305_v18 = vld [vmem:[#allocation4 + $0x208] sm:$0xff]  ;;  %v4151_v21 = vcombine.low %v297_v10, %v301_v11 }
  0x4d   :  { %3194 = vmatprep.subr.bf16.mxu0 %v4651_v0  ;;  %3221 = vmatprep.subr.bf16.mxu1 %v4106_v5  ;;  %v4114_v42 = vcombine.high %v312_v36, %v316_v37  ;;  %v320_v44 = vld [vmem:[#allocation4 + $0x280] sm:$0xff]  ;;  %v4115_v48 = vcombine.low %v312_v36, %v316_v37  ;;  %v4148_v5 = vcombine.high %v289_v62, %v293_v63 }
  0x4e   :  { %v324_v45 = vld [vmem:[#allocation4 + $0x2a0] sm:$0xff] }
  0x4f   :  { %v4116_v50 = vcombine.high %v320_v44, %v324_v45  ;;  %v328_v52 = vld [vmem:[#allocation4 + $0x2c0] sm:$0xff]  ;;  %v4117_v56 = vcombine.low %v320_v44, %v324_v45 }
  0x50   :  { %3196 = vmatpush3.bf16.msra.mxu0 %v3195_v3  ;;  %3223 = vmatpush1.bf16.msra.mxu1 %v4107_v14  ;;  %v332_v53 = vld [vmem:[#allocation4 + $0x2e0] sm:$0xff]  ;;  %v4147_v3 = vcombine.low %v281_v54, %v285_v55 }
  0x51   :  { %3197 = vmatprep.subr.bf16.mxu0 %v4651_v0  ;;  %v149_v0 = vsel %vm4880_vm8, 1.0, %v142_v17  ;;  %3225 = vmatprep.subr.bf16.mxu1 %v4108_v16  ;;  %v4118_v58 = vcombine.high %v328_v52, %v332_v53  ;;  %v336_v60 = vld [vmem:[#allocation4 + $0x300] sm:$0xff]  ;;  %v4119_v2 = vcombine.low %v328_v52, %v332_v53 }
  0x52   :  { %v340_v61 = vld [vmem:[#allocation4 + $0x320] sm:$0xff] }
  0x53   :  { %v4120_v4 = vcombine.high %v336_v60, %v340_v61  ;;  %v344_v8 = vld [vmem:[#allocation4 + $0x340] sm:$0xff]  ;;  %v4121_v12 = vcombine.low %v336_v60, %v340_v61 }
  0x54   :  { %3199 = vmatpush3.bf16.msra.mxu0 %v3198_v15  ;;  %3227 = vmatpush1.bf16.msra.mxu1 %v4109_v24  ;;  %v348_v9 = vld [vmem:[#allocation4 + $0x360] sm:$0xff]  ;;  %v4150_v15 = vcombine.high %v297_v10, %v301_v11  ;;  %v365_v10 = vld [vmem:[#allocation4 + $0x3e8] sm:$0xff] }
  0x55   :  { %3281 = vmatprep.subr.bf16.mxu0 %v4136_v19  ;;  %3229 = vmatprep.subr.bf16.mxu1 %v4110_v26  ;;  %v4122_v14 = vcombine.high %v344_v8, %v348_v9  ;;  %v352_v16 = vld [vmem:[#allocation4 + $0x380] sm:$0xff]  ;;  %v309_v19 = vld [vmem:[#allocation4 + $0x228] sm:$0xff]  ;;  %v4123_v20 = vcombine.low %v344_v8, %v348_v9 }
  0x56   :  { %v356_v17 = vld [vmem:[#allocation4 + $0x3a0] sm:$0xff]  ;;  %v4152_v7 = vcombine.high %v305_v18, %v309_v19  ;;  %v317_v26 = vld [vmem:[#allocation4 + $0x268] sm:$0xff]  ;;  %v4153_v28 = vcombine.low %v305_v18, %v309_v19 }
  0x57   :  { %3174 = vmatmul.mubr.f32.vlgmr.msra.gmra.mrb[0].mxu0 %v149_v0  ;;  %v4124_v22 = vcombine.high %v352_v16, %v356_v17  ;;  %v360_v24 = vld [vmem:[#allocation4 + $0x3c0] sm:$0xff]  ;;  %v361_v9 = vld [vmem:[#allocation4 + $0x3c8] sm:$0xff] }
  0x58   :  { %3283 = vmatpush1.bf16.msra.mxu0 %v4137_v25  ;;  %972 = vmatprep.mubr.f32.mxu0 %v4887_v23  ;;  %v364_v0 = vld [vmem:[#allocation4 + $0x3e0] sm:$0xff]  ;;  %v313_v25 = vld [vmem:[#allocation4 + $0x248] sm:$0xff] }
  0x59   :  { %3285 = vmatprep.subr.bf16.mxu0 %v4138_v27  ;;  %3231 = vmatpush1.bf16.msra.mxu1 %v4111_v32  ;;  %v4125_v27 = vcombine.low %v352_v16, %v356_v17  ;;  %v4126_v29 = vcombine.high %v360_v24, %v364_v0  ;;  %v4154_v30 = vcombine.high %v313_v25, %v317_v26  ;;  %v368_v31 = vld [vmem:[#allocation4 + $0x400] sm:$0xff]  ;;  %v377_v17 = vld [vmem:[#allocation4 + $0x448] sm:$0xff] }
  0x5a   :  { %3233 = vmatprep.subr.bf16.mxu1 %v4112_v34  ;;  %v372_v32 = vld [vmem:[#allocation4 + $0x420] sm:$0xff]  ;;  %v325_v34 = vld [vmem:[#allocation4 + $0x2a8] sm:$0xff]  ;;  %v4155_v36 = vcombine.low %v313_v25, %v317_v26 }
  0x5b   :  { %v4128_v37 = vcombine.high %v368_v31, %v372_v32  ;;  %v376_v39 = vld [vmem:[#allocation4 + $0x440] sm:$0xff]  ;;  %v381_v18 = vld [vmem:[#allocation4 + $0x468] sm:$0xff] }
  0x5c   :  { %3287 = vmatpush1.bf16.msra.mxu0 %v4139_v33  ;;  %v321_v33 = vld [vmem:[#allocation4 + $0x288] sm:$0xff]  ;;  %v4896_v44 = vld [vmem:[%s5110_s2] sm:$0xff] }
  0x5d   :  { %3289 = vmatprep.subr.bf16.mxu0 %v4140_v35  ;;  %3235 = vmatpush1.bf16.msra.mxu1 %v4113_v40  ;;  %v4127_v35 = vcombine.low %v360_v24, %v364_v0  ;;  %v4156_v38 = vcombine.high %v321_v33, %v325_v34  ;;  %v380_v40 = vld [vmem:[#allocation4 + $0x460] sm:$0xff]  ;;  %v4157_v45 = vcombine.low %v321_v33, %v325_v34  ;;  %v393_v0 = vld [vmem:[#allocation4 + $0x4c8] sm:$0xff]  ;;  %v247_v33 = vld [vmem:[#allocation4 + $0x38] sm:$0xff] }
  0x5e   :  { %3237 = vmatprep.subr.bf16.mxu1 %v4114_v42  ;;  %v333_v42 = vld [vmem:[#allocation4 + $0x2e8] sm:$0xff]  ;;  %v4130_v46 = vcombine.high %v376_v39, %v380_v40  ;;  %v4131_v52 = vcombine.low %v376_v39, %v380_v40  ;;  %v251_v39 = vld [vmem:[#allocation4 + $0x58] sm:$0xff] }
  0x5f   :  { %v397_v25 = vld [vmem:[#allocation4 + $0x4e8] sm:$0xff]  ;;  %v255_v40 = vld [vmem:[#allocation4 + $0x78] sm:$0xff] }
  0x60   :  { %3291 = vmatpush1.bf16.msra.mxu0 %v4141_v41  ;;  %v329_v41 = vld [vmem:[#allocation4 + $0x2c8] sm:$0xff] }
  0x61   :  { %3293 = vmatprep.subr.bf16.mxu0 %v4142_v43  ;;  %3239 = vmatpush1.bf16.msra.mxu1 %v4115_v48  ;;  %v4129_v43 = vcombine.low %v368_v31, %v372_v32  ;;  %v4158_v47 = vcombine.high %v329_v41, %v333_v42  ;;  %v384_v48 = vld [vmem:[#allocation4 + $0x480] sm:$0xff]  ;;  %v4159_v53 = vcombine.low %v329_v41, %v333_v42  ;;  %v243_v31 = vld [vmem:[#allocation4 + $0x18] sm:$0xff] }
  0x62   :  { %3241 = vmatprep.subr.bf16.mxu1 %v4116_v50  ;;  %v337_v50 = vld [vmem:[#allocation4 + $0x308] sm:$0xff]  ;;  %v4218_v42 = vcombine.high %v251_v39, %v255_v40 }
  0x64   :  { %3295 = vmatpush1.bf16.msra.mxu0 %v4143_v49  ;;  %v388_v49 = vld [vmem:[#allocation4 + $0x4a0] sm:$0xff] }
  0x65   :  { %3297 = vmatprep.subr.bf16.mxu0 %v4144_v51  ;;  %3243 = vmatpush1.bf16.msra.mxu1 %v4117_v56  ;;  %v341_v51 = vld [vmem:[#allocation4 + $0x328] sm:$0xff]  ;;  %v4132_v54 = vcombine.high %v384_v48, %v388_v49  ;;  %v392_v56 = vld [vmem:[#allocation4 + $0x4c0] sm:$0xff]  ;;  %v4133_v60 = vcombine.low %v384_v48, %v388_v49  ;;  %v263_v48 = vld [vmem:[#allocation4 + $0xb8] sm:$0xff] }
  0x66   :  { %3245 = vmatprep.subr.bf16.mxu1 %v4118_v58  ;;  %v4160_v55 = vcombine.high %v337_v50, %v341_v51  ;;  %v345_v58 = vld [vmem:[#allocation4 + $0x348] sm:$0xff]  ;;  %v4161_v61 = vcombine.low %v337_v50, %v341_v51  ;;  %v4219_v51 = vcombine.low %v251_v39, %v255_v40  ;;  %v314_v40 = vld [vmem:[#allocation4 + $0x250] sm:$0xff] }
  0x68   :  { %3299 = vmatpush1.bf16.msra.mxu0 %v4145_v57  ;;  %v396_v57 = vld [vmem:[#allocation4 + $0x4e0] sm:$0xff] }
  0x69   :  { %3301 = vmatprep.subr.bf16.mxu0 %v4146_v59  ;;  %3247 = vmatpush1.bf16.msra.mxu1 %v4119_v2  ;;  %v349_v59 = vld [vmem:[#allocation4 + $0x368] sm:$0xff]  ;;  %v4134_v62 = vcombine.high %v392_v56, %v396_v57 }
  0x6a   :  { %3249 = vmatprep.subr.bf16.mxu1 %v4120_v4  ;;  %v4162_v63 = vcombine.high %v345_v58, %v349_v59  ;;  %v353_v2 = vld [vmem:[#allocation4 + $0x388] sm:$0xff]  ;;  %v4135_v4 = vcombine.low %v392_v56, %v396_v57  ;;  %v267_v56 = vld [vmem:[#allocation4 + $0xd8] sm:$0xff] }
  0x6b   :  { %v271_v57 = vld [vmem:[#allocation4 + $0xf8] sm:$0xff] }
  0x6c   :  { %3303 = vmatpush1.bf16.msra.mxu0 %v4147_v3  ;;  %v357_v3 = vld [vmem:[#allocation4 + $0x3a8] sm:$0xff] }
  0x6d   :  { %3305 = vmatprep.subr.bf16.mxu0 %v4148_v5  ;;  %3251 = vmatpush1.bf16.msra.mxu1 %v4121_v12  ;;  %v4163_v5 = vcombine.low %v345_v58, %v349_v59  ;;  %v4164_v8 = vcombine.high %v353_v2, %v357_v3  ;;  %v4165_v11 = vcombine.low %v353_v2, %v357_v3  ;;  %v275_v2 = vld [vmem:[#allocation4 + $0x118] sm:$0xff] }
  0x6e   :  { %3253 = vmatprep.subr.bf16.mxu1 %v4122_v14  ;;  %v4166_v12 = vcombine.high %v361_v9, %v365_v10  ;;  %v373_v14 = vld [vmem:[#allocation4 + $0x428] sm:$0xff]  ;;  %v279_v3 = vld [vmem:[#allocation4 + $0x138] sm:$0xff] }
  0x70   :  { %3307 = vmatpush1.bf16.msra.mxu0 %v4149_v13  ;;  %v369_v13 = vld [vmem:[#allocation4 + $0x408] sm:$0xff] }
  0x71   :  { %3309 = vmatprep.subr.bf16.mxu0 %v4150_v15  ;;  %3255 = vmatpush1.bf16.msra.mxu1 %v4123_v20  ;;  %v4167_v15 = vcombine.low %v361_v9, %v365_v10  ;;  %v4168_v16 = vcombine.high %v369_v13, %v373_v14  ;;  %v4169_v19 = vcombine.low %v369_v13, %v373_v14  ;;  %v282_v9 = vld [vmem:[#allocation4 + $0x150] sm:$0xff] }
  0x72   :  { %3257 = vmatprep.subr.bf16.mxu1 %v4124_v22  ;;  %v4170_v20 = vcombine.high %v377_v17, %v381_v18  ;;  %v389_v22 = vld [vmem:[#allocation4 + $0x4a8] sm:$0xff]  ;;  %v286_v10 = vld [vmem:[#allocation4 + $0x170] sm:$0xff]  ;;  %v4225_v14 = vcombine.low %v275_v2, %v279_v3 }
  0x74   :  { %3311 = vmatpush1.bf16.msra.mxu0 %v4151_v21  ;;  %v385_v21 = vld [vmem:[#allocation4 + $0x488] sm:$0xff] }
  0x75   :  { %3313 = vmatprep.subr.bf16.mxu0 %v4152_v7  ;;  %3259 = vmatpush1.bf16.msra.mxu1 %v4125_v27  ;;  %v4171_v7 = vcombine.low %v377_v17, %v381_v18  ;;  %v4172_v24 = vcombine.high %v385_v21, %v389_v22  ;;  %v4173_v26 = vcombine.low %v385_v21, %v389_v22  ;;  %v290_v17 = vld [vmem:[#allocation4 + $0x190] sm:$0xff] }
  0x76   :  { %3261 = vmatprep.subr.bf16.mxu1 %v4126_v29  ;;  %v4174_v27 = vcombine.high %v393_v0, %v397_v25  ;;  %v242_v29 = vld [vmem:[#allocation4 + $0x10] sm:$0xff]  ;;  %v4187_v21 = vcombine.low %v282_v9, %v286_v10 }
  0x77   :  { %v294_v18 = vld [vmem:[#allocation4 + $0x1b0] sm:$0xff] }
  0x78   :  { %3315 = vmatpush1.bf16.msra.mxu0 %v4153_v28  ;;  %v4175_v28 = vcombine.low %v393_v0, %v397_v25  ;;  %v298_v0 = vld [vmem:[#allocation4 + $0x1d0] sm:$0xff] }
  0x79   :  { %3317 = vmatprep.subr.bf16.mxu0 %v4154_v30  ;;  %3263 = vmatpush1.bf16.msra.mxu1 %v4127_v35  ;;  %v246_v30 = vld [vmem:[#allocation4 + $0x30] sm:$0xff]  ;;  %v4216_v35 = vcombine.high %v243_v31, %v247_v33 }
  0x7a   :  { %3265 = vmatprep.subr.bf16.mxu1 %v4128_v37  ;;  %v4176_v32 = vcombine.high %v242_v29, %v246_v30  ;;  %v4177_v34 = vcombine.low %v242_v29, %v246_v30  ;;  %v250_v37 = vld [vmem:[#allocation4 + $0x50] sm:$0xff] }
  0x7b   :  { %v302_v25 = vld [vmem:[#allocation4 + $0x1f0] sm:$0xff] }
  0x7c   :  { %3319 = vmatpush1.bf16.msra.mxu0 %v4155_v36  ;;  %831 = vmatmul.mubr.f32.vlgmr.msra.gmra.mrb[0].mxu1 %v4896_v44  ;;  %v4217_v36 = vcombine.low %v243_v31, %v247_v33  ;;  %v4190_v30 = vcombine.high %v298_v0, %v302_v25  ;;  %v310_v33 = vld [vmem:[#allocation4 + $0x230] sm:$0xff] }
  0x7d   :  { %3321 = vmatprep.subr.bf16.mxu0 %v4156_v38  ;;  %3267 = vmatpush1.bf16.msra.mxu1 %v4129_v43  ;;  %v254_v38 = vld [vmem:[#allocation4 + $0x70] sm:$0xff] }
  0x7e   :  { %901 = vmatprep.mubr.f32.mxu1 %v4653_v1  ;;  %3269 = vmatprep.subr.bf16.mxu1 %v4130_v46  ;;  %v4178_v41 = vcombine.high %v250_v37, %v254_v38  ;;  %v258_v43 = vld [vmem:[#allocation4 + $0x90] sm:$0xff]  ;;  %v4179_v50 = vcombine.low %v250_v37, %v254_v38 }
  0x7f   :  { %v262_v46 = vld [vmem:[#allocation4 + $0xb0] sm:$0xff] }
  0x80   :  { %3323 = vmatpush1.bf16.msra.mxu0 %v4157_v45  ;;  %v4181_v58 = vcombine.low %v258_v43, %v262_v46 }
  0x81   :  { %3325 = vmatprep.subr.bf16.mxu0 %v4158_v47  ;;  %3271 = vmatpush1.bf16.msra.mxu1 %v4131_v52  ;;  %v259_v47 = vld [vmem:[#allocation4 + $0x98] sm:$0xff]  ;;  %v4180_v52 = vcombine.high %v258_v43, %v262_v46 }
  0x82   :  { %3273 = vmatprep.subr.bf16.mxu1 %v4132_v54  ;;  %v266_v54 = vld [vmem:[#allocation4 + $0xd0] sm:$0xff]  ;;  %v4221_v59 = vcombine.low %v259_v47, %v263_v48  ;;  %v319_v43 = vld [vmem:[#allocation4 + $0x278] sm:$0xff] }
  0x84   :  { %3327 = vmatpush1.bf16.msra.mxu0 %v4159_v53  ;;  %v4220_v53 = vcombine.high %v259_v47, %v263_v48 }
  0x85   :  { %3329 = vmatprep.subr.bf16.mxu0 %v4160_v55  ;;  %3275 = vmatpush1.bf16.msra.mxu1 %v4133_v60  ;;  %v270_v55 = vld [vmem:[#allocation4 + $0xf0] sm:$0xff] }
  0x86   :  { %3277 = vmatprep.subr.bf16.mxu1 %v4134_v62  ;;  %v4182_v60 = vcombine.high %v266_v54, %v270_v55  ;;  %v274_v62 = vld [vmem:[#allocation4 + $0x110] sm:$0xff] }
  0x88   :  { %3331 = vmatpush1.bf16.msra.mxu0 %v4161_v61  ;;  %v4222_v61 = vcombine.high %v267_v56, %v271_v57 }
  0x89   :  { %3333 = vmatprep.subr.bf16.mxu0 %v4162_v63  ;;  %3279 = vmatpush1.bf16.msra.mxu1 %v4135_v4  ;;  %v278_v63 = vld [vmem:[#allocation4 + $0x130] sm:$0xff]  ;;  %v4183_v4 = vcombine.low %v266_v54, %v270_v55 }
  0x8a   :  { %3361 = vmatprep.subr.bf16.mxu1 %v4176_v32  ;;  %v4185_v13 = vcombine.low %v274_v62, %v278_v63  ;;  %v306_v32 = vld [vmem:[#allocation4 + $0x210] sm:$0xff] }
  0x8b   :  { %v4192_v38 = vcombine.high %v306_v32, %v310_v33  ;;  %v4193_v46 = vcombine.low %v306_v32, %v310_v33 }
  0x8c   :  { %3335 = vmatpush1.bf16.msra.mxu0 %v4163_v5  ;;  %v4223_v5 = vcombine.low %v267_v56, %v271_v57 }
  0x8d   :  { %3337 = vmatprep.subr.bf16.mxu0 %v4164_v8  ;;  %v4184_v8 = vcombine.high %v274_v62, %v278_v63 }
  0x90   :  { %3339 = vmatpush1.bf16.msra.mxu0 %v4165_v11  ;;  %v283_v11 = vld [vmem:[#allocation4 + $0x158] sm:$0xff] }
  0x91   :  { %3341 = vmatprep.subr.bf16.mxu0 %v4166_v12  ;;  %v287_v12 = vld [vmem:[#allocation4 + $0x178] sm:$0xff] }
  0x92   :  { %v4227_v22 = vcombine.low %v283_v11, %v287_v12 }
  0x94   :  { %3343 = vmatpush1.bf16.msra.mxu0 %v4167_v15  ;;  %v4186_v15 = vcombine.high %v282_v9, %v286_v10 }
  0x95   :  { %3345 = vmatprep.subr.bf16.mxu0 %v4168_v16  ;;  %v4226_v16 = vcombine.high %v283_v11, %v287_v12 }
  0x97   :  { %973 = vmatmul.mubr.f32.vlgmr.msra.gmra.mrb[2].mxu0 %v4896_v44 }
  0x98   :  { %3347 = vmatpush1.bf16.msra.mxu0 %v4169_v19  ;;  %1043 = vmatprep.mubr.f32.mxu0 %v4653_v1  ;;  %v291_v19 = vld [vmem:[#allocation4 + $0x198] sm:$0xff] }
  0x99   :  { %3349 = vmatprep.subr.bf16.mxu0 %v4170_v20  ;;  %v295_v20 = vld [vmem:[#allocation4 + $0x1b8] sm:$0xff] }
  0x9a   :  { %v4229_v29 = vcombine.low %v291_v19, %v295_v20 }
  0x9c   :  { %3351 = vmatpush1.bf16.msra.mxu0 %v4171_v7  ;;  %v4188_v7 = vcombine.high %v290_v17, %v294_v18 }
  0x9d   :  { %3353 = vmatprep.subr.bf16.mxu0 %v4172_v24  ;;  %v4228_v24 = vcombine.high %v291_v19, %v295_v20 }
  0xa0   :  { %3355 = vmatpush1.bf16.msra.mxu0 %v4173_v26  ;;  %v299_v26 = vld [vmem:[#allocation4 + $0x1d8] sm:$0xff] }
  0xa1   :  { %3357 = vmatprep.subr.bf16.mxu0 %v4174_v27  ;;  %v303_v27 = vld [vmem:[#allocation4 + $0x1f8] sm:$0xff] }
  0xa2   :  { %v4230_v31 = vcombine.high %v299_v26, %v303_v27  ;;  %v4231_v37 = vcombine.low %v299_v26, %v303_v27 }
  0xa4   :  { %3359 = vmatpush1.bf16.msra.mxu0 %v4175_v28  ;;  %v4189_v28 = vcombine.low %v290_v17, %v294_v18 }
  0xa5   :  { %3441 = vmatprep.subr.bf16.mxu0 %v4216_v35  ;;  %v311_v35 = vld [vmem:[#allocation4 + $0x238] sm:$0xff] }
 0x12a   :  { %v4902_v45 = vpop.f32.mrb[0].mxu0 }
 0x12b   :  { %v3175_v49 = vpop.f32.mrb[1].mxu0  ;;  %2985 = vmatmul.mubr.msk.f32.vlgmr.msra.gmra.mrb[0].mxu1 %vm762_vm9, %v4902_v45  ;;  %2986 = vmatmul.mubr.msk.f32.vlgmr.msra.gmra.mrb[2].mxu0 %vm762_vm9, %v4902_v45 }
 0x12c   :  { %3363 = vmatpush1.bf16.msra.mxu1 %v4177_v34  ;;  %3443 = vmatpush1.bf16.msra.mxu0 %v4217_v36  ;;  %v307_v34 = vld [vmem:[#allocation4 + $0x218] sm:$0xff]  ;;  %v4191_v36 = vcombine.low %v298_v0, %v302_v25 }
 0x12d   :  { %3365 = vmatprep.subr.bf16.mxu1 %v4178_v41  ;;  %3445 = vmatprep.subr.bf16.mxu0 %v4218_v42  ;;  %v4232_v39 = vcombine.high %v307_v34, %v311_v35  ;;  %v318_v41 = vld [vmem:[#allocation4 + $0x270] sm:$0xff]  ;;  %v315_v42 = vld [vmem:[#allocation4 + $0x258] sm:$0xff]  ;;  %v4233_v47 = vcombine.low %v307_v34, %v311_v35 }
 0x12e   :  { %1114 = vmatprep.mubr.f32.mxu1 %v4887_v23  ;;  %1256 = vmatprep.mubr.f32.mxu0 %v4887_v23  ;;  %v4224_v23 = vcombine.high %v275_v2, %v279_v3  ;;  %v4194_v48 = vcombine.high %v314_v40, %v318_v41  ;;  %v4234_v49 = vcombine.high %v315_v42, %v319_v43 }
 0x12f   :  { %v4195_v54 = vcombine.low %v314_v40, %v318_v41  ;;  %v4235_v55 = vcombine.low %v315_v42, %v319_v43 }
 0x130   :  { %3367 = vmatpush1.bf16.msra.mxu1 %v4179_v50  ;;  %3447 = vmatpush1.bf16.msra.mxu0 %v4219_v51  ;;  %v322_v50 = vld [vmem:[#allocation4 + $0x290] sm:$0xff] }
 0x131   :  { %3369 = vmatprep.subr.bf16.mxu1 %v4180_v52  ;;  %3449 = vmatprep.subr.bf16.mxu0 %v4220_v53  ;;  %v326_v51 = vld [vmem:[#allocation4 + $0x2b0] sm:$0xff]  ;;  %v323_v52 = vld [vmem:[#allocation4 + $0x298] sm:$0xff] }
 0x132   :  { %v327_v53 = vld [vmem:[#allocation4 + $0x2b8] sm:$0xff]  ;;  %v4196_v56 = vcombine.high %v322_v50, %v326_v51  ;;  %v4197_v62 = vcombine.low %v322_v50, %v326_v51 }
 0x133   :  { %v4236_v57 = vcombine.high %v323_v52, %v327_v53  ;;  %v4237_v63 = vcombine.low %v323_v52, %v327_v53 }
 0x134   :  { %3371 = vmatpush1.bf16.msra.mxu1 %v4181_v58  ;;  %3451 = vmatpush1.bf16.msra.mxu0 %v4221_v59  ;;  %v330_v58 = vld [vmem:[#allocation4 + $0x2d0] sm:$0xff] }
 0x135   :  { %3373 = vmatprep.subr.bf16.mxu1 %v4182_v60  ;;  %3453 = vmatprep.subr.bf16.mxu0 %v4222_v61  ;;  %v334_v59 = vld [vmem:[#allocation4 + $0x2f0] sm:$0xff]  ;;  %v331_v60 = vld [vmem:[#allocation4 + $0x2d8] sm:$0xff] }
 0x136   :  { %v335_v61 = vld [vmem:[#allocation4 + $0x2f8] sm:$0xff]  ;;  %v4198_v2 = vcombine.high %v330_v58, %v334_v59  ;;  %v4199_v9 = vcombine.low %v330_v58, %v334_v59 }
 0x137   :  { %v4238_v3 = vcombine.high %v331_v60, %v335_v61  ;;  %v4239_v10 = vcombine.low %v331_v60, %v335_v61 }
 0x138   :  { %3375 = vmatpush1.bf16.msra.mxu1 %v4183_v4  ;;  %3455 = vmatpush1.bf16.msra.mxu0 %v4223_v5  ;;  %v338_v4 = vld [vmem:[#allocation4 + $0x310] sm:$0xff] }
 0x139   :  { %3377 = vmatprep.subr.bf16.mxu1 %v4184_v8  ;;  %3457 = vmatprep.subr.bf16.mxu0 %v4224_v23  ;;  %v342_v5 = vld [vmem:[#allocation4 + $0x330] sm:$0xff]  ;;  %v339_v8 = vld [vmem:[#allocation4 + $0x318] sm:$0xff] }
 0x13a   :  { %v343_v23 = vld [vmem:[#allocation4 + $0x338] sm:$0xff]  ;;  %v4200_v11 = vcombine.high %v338_v4, %v342_v5  ;;  %v4201_v17 = vcombine.low %v338_v4, %v342_v5 }
 0x13b   :  { %v4240_v12 = vcombine.high %v339_v8, %v343_v23  ;;  %v4241_v18 = vcombine.low %v339_v8, %v343_v23  ;;  %v1388_v23 = vld [vmem:[#allocation6] sm:$0xff] }
 0x13c   :  { %3379 = vmatpush1.bf16.msra.mxu1 %v4185_v13  ;;  %3459 = vmatpush1.bf16.msra.mxu0 %v4225_v14  ;;  %v346_v13 = vld [vmem:[#allocation4 + $0x350] sm:$0xff] }
 0x13d   :  { %3381 = vmatprep.subr.bf16.mxu1 %v4186_v15  ;;  %3461 = vmatprep.subr.bf16.mxu0 %v4226_v16  ;;  %v350_v14 = vld [vmem:[#allocation4 + $0x370] sm:$0xff]  ;;  %v347_v15 = vld [vmem:[#allocation4 + $0x358] sm:$0xff] }
 0x13e   :  { %v351_v16 = vld [vmem:[#allocation4 + $0x378] sm:$0xff]  ;;  %v4202_v19 = vcombine.high %v346_v13, %v350_v14  ;;  %v4203_v0 = vcombine.low %v346_v13, %v350_v14 }
 0x13f   :  { %v4242_v20 = vcombine.high %v347_v15, %v351_v16  ;;  %v4243_v25 = vcombine.low %v347_v15, %v351_v16  ;;  %v1396_v15 = vld [vmem:[#allocation6 + $0x40] sm:$0xff] }
 0x140   :  { %3383 = vmatpush1.bf16.msra.mxu1 %v4187_v21  ;;  %3463 = vmatpush1.bf16.msra.mxu0 %v4227_v22  ;;  %v354_v21 = vld [vmem:[#allocation4 + $0x390] sm:$0xff]  ;;  %v1400_v16 = vld [vmem:[#allocation6 + $0x60] sm:$0xff] }
 0x141   :  { %3385 = vmatprep.subr.bf16.mxu1 %v4188_v7  ;;  %3465 = vmatprep.subr.bf16.mxu0 %v4228_v24  ;;  %v358_v22 = vld [vmem:[#allocation4 + $0x3b0] sm:$0xff]  ;;  %v355_v7 = vld [vmem:[#allocation4 + $0x398] sm:$0xff] }
 0x142   :  { %v359_v24 = vld [vmem:[#allocation4 + $0x3b8] sm:$0xff]  ;;  %v4204_v26 = vcombine.high %v354_v21, %v358_v22  ;;  %v4205_v32 = vcombine.low %v354_v21, %v358_v22  ;;  %v4258_v21 = vcombine.high %v1396_v15, %v1400_v16 }
 0x143   :  { %v4244_v27 = vcombine.high %v355_v7, %v359_v24  ;;  %v4245_v33 = vcombine.low %v355_v7, %v359_v24  ;;  %v1404_v7 = vld [vmem:[#allocation6 + $0x80] sm:$0xff] }
 0x144   :  { %3387 = vmatpush1.bf16.msra.mxu1 %v4189_v28  ;;  %3467 = vmatpush1.bf16.msra.mxu0 %v4229_v29  ;;  %v362_v28 = vld [vmem:[#allocation4 + $0x3d0] sm:$0xff]  ;;  %v1408_v24 = vld [vmem:[#allocation6 + $0xa0] sm:$0xff] }
 0x145   :  { %3389 = vmatprep.subr.bf16.mxu1 %v4190_v30  ;;  %3469 = vmatprep.subr.bf16.mxu0 %v4230_v31  ;;  %v366_v29 = vld [vmem:[#allocation4 + $0x3f0] sm:$0xff]  ;;  %v363_v30 = vld [vmem:[#allocation4 + $0x3d8] sm:$0xff] }
 0x146   :  { %v367_v31 = vld [vmem:[#allocation4 + $0x3f8] sm:$0xff]  ;;  %v4206_v34 = vcombine.high %v362_v28, %v366_v29  ;;  %v4207_v40 = vcombine.low %v362_v28, %v366_v29  ;;  %v4260_v28 = vcombine.high %v1404_v7, %v1408_v24 }
 0x147   :  { %v4246_v35 = vcombine.high %v363_v30, %v367_v31  ;;  %v4247_v41 = vcombine.low %v363_v30, %v367_v31  ;;  %v1412_v30 = vld [vmem:[#allocation6 + $0xc0] sm:$0xff] }
 0x148   :  { %3391 = vmatpush1.bf16.msra.mxu1 %v4191_v36  ;;  %3471 = vmatpush1.bf16.msra.mxu0 %v4231_v37  ;;  %v370_v36 = vld [vmem:[#allocation4 + $0x410] sm:$0xff]  ;;  %v1416_v31 = vld [vmem:[#allocation6 + $0xe0] sm:$0xff] }
 0x149   :  { %3393 = vmatprep.subr.bf16.mxu1 %v4192_v38  ;;  %3473 = vmatprep.subr.bf16.mxu0 %v4232_v39  ;;  %v374_v37 = vld [vmem:[#allocation4 + $0x430] sm:$0xff]  ;;  %v371_v38 = vld [vmem:[#allocation4 + $0x418] sm:$0xff] }
 0x14a   :  { %v375_v39 = vld [vmem:[#allocation4 + $0x438] sm:$0xff]  ;;  %v4208_v42 = vcombine.high %v370_v36, %v374_v37  ;;  %v4209_v50 = vcombine.low %v370_v36, %v374_v37  ;;  %v4262_v36 = vcombine.high %v1412_v30, %v1416_v31  ;;  %v1420_v37 = vld [vmem:[#allocation6 + $0x100] sm:$0xff] }
 0x14b   :  { %v4248_v43 = vcombine.high %v371_v38, %v375_v39  ;;  %v4249_v51 = vcombine.low %v371_v38, %v375_v39  ;;  %v1424_v38 = vld [vmem:[#allocation6 + $0x120] sm:$0xff]  ;;  %v1421_v39 = vld [vmem:[#allocation6 + $0x108] sm:$0xff] }
 0x14c   :  { %3395 = vmatpush1.bf16.msra.mxu1 %v4193_v46  ;;  %3475 = vmatpush1.bf16.msra.mxu0 %v4233_v47  ;;  %v378_v46 = vld [vmem:[#allocation4 + $0x450] sm:$0xff] }
 0x14d   :  { %3397 = vmatprep.subr.bf16.mxu1 %v4194_v48  ;;  %3477 = vmatprep.subr.bf16.mxu0 %v4234_v49  ;;  %v382_v47 = vld [vmem:[#allocation4 + $0x470] sm:$0xff]  ;;  %v379_v48 = vld [vmem:[#allocation4 + $0x458] sm:$0xff] }
 0x14e   :  { %v383_v49 = vld [vmem:[#allocation4 + $0x478] sm:$0xff]  ;;  %v4210_v52 = vcombine.high %v378_v46, %v382_v47  ;;  %v4211_v58 = vcombine.low %v378_v46, %v382_v47  ;;  %v1428_v47 = vld [vmem:[#allocation6 + $0x140] sm:$0xff] }
 0x14f   :  { %v4250_v53 = vcombine.high %v379_v48, %v383_v49  ;;  %v4251_v59 = vcombine.low %v379_v48, %v383_v49  ;;  %v1432_v48 = vld [vmem:[#allocation6 + $0x160] sm:$0xff]  ;;  %v1429_v49 = vld [vmem:[#allocation6 + $0x148] sm:$0xff] }
 0x150   :  { %3399 = vmatpush1.bf16.msra.mxu1 %v4195_v54  ;;  %3479 = vmatpush1.bf16.msra.mxu0 %v4235_v55  ;;  %v386_v54 = vld [vmem:[#allocation4 + $0x490] sm:$0xff] }
 0x151   :  { %3401 = vmatprep.subr.bf16.mxu1 %v4196_v56  ;;  %3481 = vmatprep.subr.bf16.mxu0 %v4236_v57  ;;  %v390_v55 = vld [vmem:[#allocation4 + $0x4b0] sm:$0xff]  ;;  %v387_v56 = vld [vmem:[#allocation4 + $0x498] sm:$0xff] }
 0x152   :  { %v391_v57 = vld [vmem:[#allocation4 + $0x4b8] sm:$0xff]  ;;  %v4212_v60 = vcombine.high %v386_v54, %v390_v55  ;;  %v4213_v4 = vcombine.low %v386_v54, %v390_v55  ;;  %v1436_v55 = vld [vmem:[#allocation6 + $0x180] sm:$0xff] }
 0x153   :  { %v4252_v61 = vcombine.high %v387_v56, %v391_v57 }
 0x154   :  { %3403 = vmatpush1.bf16.msra.mxu1 %v4197_v62  ;;  %3483 = vmatpush1.bf16.msra.mxu0 %v4237_v63  ;;  %v394_v62 = vld [vmem:[#allocation4 + $0x4d0] sm:$0xff] }
 0x155   :  { %3405 = vmatprep.subr.bf16.mxu1 %v4198_v2  ;;  %3485 = vmatprep.subr.bf16.mxu0 %v4238_v3  ;;  %v398_v63 = vld [vmem:[#allocation4 + $0x4f0] sm:$0xff]  ;;  %v395_v2 = vld [vmem:[#allocation4 + $0x4d8] sm:$0xff] }
 0x156   :  { %v399_v3 = vld [vmem:[#allocation4 + $0x4f8] sm:$0xff]  ;;  %v4214_v5 = vcombine.high %v394_v62, %v398_v63 }
 0x157   :  { %v4254_v8 = vcombine.high %v395_v2, %v399_v3  ;;  %v4255_v13 = vcombine.low %v395_v2, %v399_v3  ;;  %v1448_v2 = vld [vmem:[#allocation6 + $0x1e0] sm:$0xff]  ;;  %v1445_v3 = vld [vmem:[#allocation6 + $0x1c8] sm:$0xff] }
 0x158   :  { %3407 = vmatpush1.bf16.msra.mxu1 %v4199_v9  ;;  %3487 = vmatpush1.bf16.msra.mxu0 %v4239_v10  ;;  %v1392_v9 = vld [vmem:[#allocation6 + $0x20] sm:$0xff]  ;;  %v1389_v10 = vld [vmem:[#allocation6 + $0x8] sm:$0xff] }
 0x159   :  { %3409 = vmatprep.subr.bf16.mxu1 %v4200_v11  ;;  %3489 = vmatprep.subr.bf16.mxu0 %v4240_v12  ;;  %v1393_v11 = vld [vmem:[#allocation6 + $0x28] sm:$0xff]  ;;  %v4215_v12 = vcombine.low %v394_v62, %v398_v63  ;;  %v4256_v14 = vcombine.high %v1388_v23, %v1392_v9  ;;  %v1444_v63 = vld [vmem:[#allocation6 + $0x1c0] sm:$0xff] }
 0x15c   :  { %3411 = vmatpush1.bf16.msra.mxu1 %v4201_v17  ;;  %3491 = vmatpush1.bf16.msra.mxu0 %v4241_v18  ;;  %v1397_v17 = vld [vmem:[#allocation6 + $0x48] sm:$0xff] }
 0x15d   :  { %3413 = vmatprep.subr.bf16.mxu1 %v4202_v19  ;;  %3493 = vmatprep.subr.bf16.mxu0 %v4242_v20  ;;  %v1401_v18 = vld [vmem:[#allocation6 + $0x68] sm:$0xff]  ;;  %v4257_v19 = vcombine.low %v1388_v23, %v1392_v9  ;;  %v4321_v20 = vcombine.low %v1389_v10, %v1393_v11  ;;  %v1452_v9 = vld [vmem:[#allocation6 + $0x200] sm:$0xff] }
 0x15e   :  { %v4322_v22 = vcombine.high %v1397_v17, %v1401_v18 }
 0x160   :  { %3415 = vmatpush1.bf16.msra.mxu1 %v4203_v0  ;;  %3495 = vmatpush1.bf16.msra.mxu0 %v4243_v25  ;;  %v1405_v0 = vld [vmem:[#allocation6 + $0x88] sm:$0xff] }
 0x161   :  { %3417 = vmatprep.subr.bf16.mxu1 %v4204_v26  ;;  %3497 = vmatprep.subr.bf16.mxu0 %v4244_v27  ;;  %v1409_v25 = vld [vmem:[#allocation6 + $0xa8] sm:$0xff]  ;;  %v4259_v26 = vcombine.low %v1396_v15, %v1400_v16  ;;  %v4323_v27 = vcombine.low %v1397_v17, %v1401_v18  ;;  %v1460_v16 = vld [vmem:[#allocation6 + $0x240] sm:$0xff] }
 0x162   :  { %v4324_v29 = vcombine.high %v1405_v0, %v1409_v25  ;;  %v1464_v17 = vld [vmem:[#allocation6 + $0x260] sm:$0xff]  ;;  %v1461_v18 = vld [vmem:[#allocation6 + $0x248] sm:$0xff] }
 0x164   :  { %3419 = vmatpush1.bf16.msra.mxu1 %v4205_v32  ;;  %3499 = vmatpush1.bf16.msra.mxu0 %v4245_v33  ;;  %v1413_v32 = vld [vmem:[#allocation6 + $0xc8] sm:$0xff] }
 0x165   :  { %3421 = vmatprep.subr.bf16.mxu1 %v4206_v34  ;;  %3501 = vmatprep.subr.bf16.mxu0 %v4246_v35  ;;  %v1417_v33 = vld [vmem:[#allocation6 + $0xe8] sm:$0xff]  ;;  %v4261_v34 = vcombine.low %v1404_v7, %v1408_v24  ;;  %v4325_v35 = vcombine.low %v1405_v0, %v1409_v25  ;;  %v1468_v24 = vld [vmem:[#allocation6 + $0x280] sm:$0xff] }
 0x166   :  { %v1472_v0 = vld [vmem:[#allocation6 + $0x2a0] sm:$0xff]  ;;  %v1469_v25 = vld [vmem:[#allocation6 + $0x288] sm:$0xff] }
 0x168   :  { %3423 = vmatpush1.bf16.msra.mxu1 %v4207_v40  ;;  %3503 = vmatpush1.bf16.msra.mxu0 %v4247_v41  ;;  %v1425_v40 = vld [vmem:[#allocation6 + $0x128] sm:$0xff]  ;;  %v4263_v41 = vcombine.low %v1412_v30, %v1416_v31  ;;  %v1476_v31 = vld [vmem:[#allocation6 + $0x2c0] sm:$0xff] }
 0x169   :  { %3425 = vmatprep.subr.bf16.mxu1 %v4208_v42  ;;  %3505 = vmatprep.subr.bf16.mxu0 %v4248_v43  ;;  %v4327_v42 = vcombine.low %v1413_v32, %v1417_v33  ;;  %v4264_v43 = vcombine.high %v1420_v37, %v1424_v38  ;;  %v4328_v46 = vcombine.high %v1421_v39, %v1425_v40 }
 0x16b   :  { %1115 = vmatmul.mubr.f32.vlgmr.msra.gmra.mrb[2].mxu1 %v4896_v44  ;;  %1257 = vmatmul.mubr.f32.vlgmr.msra.gmra.mrb[4].mxu0 %v4896_v44  ;;  %v4253_v44 = vcombine.low %v387_v56, %v391_v57  ;;  %v1440_v56 = vld [vmem:[#allocation6 + $0x1a0] sm:$0xff]  ;;  %v1437_v57 = vld [vmem:[#allocation6 + $0x188] sm:$0xff] }
 0x16c   :  { %3427 = vmatpush1.bf16.msra.mxu1 %v4209_v50  ;;  %3507 = vmatpush1.bf16.msra.mxu0 %v4249_v51  ;;  %v1433_v50 = vld [vmem:[#allocation6 + $0x168] sm:$0xff]  ;;  %v4265_v51 = vcombine.low %v1420_v37, %v1424_v38  ;;  %v1484_v38 = vld [vmem:[#allocation6 + $0x300] sm:$0xff] }
 0x16d   :  { %3429 = vmatprep.subr.bf16.mxu1 %v4210_v52  ;;  %3509 = vmatprep.subr.bf16.mxu0 %v4250_v53  ;;  %v4329_v52 = vcombine.low %v1421_v39, %v1425_v40  ;;  %v4266_v53 = vcombine.high %v1428_v47, %v1432_v48  ;;  %v4330_v54 = vcombine.high %v1429_v49, %v1433_v50  ;;  %v1488_v39 = vld [vmem:[#allocation6 + $0x320] sm:$0xff]  ;;  %v1485_v40 = vld [vmem:[#allocation6 + $0x308] sm:$0xff] }
 0x16e   :  { %1185 = vmatprep.mubr.f32.mxu1 %v4653_v1  ;;  %1327 = vmatprep.mubr.f32.mxu0 %v4653_v1  ;;  %v4320_v1 = vcombine.high %v1389_v10, %v1393_v11  ;;  %v1456_v10 = vld [vmem:[#allocation6 + $0x220] sm:$0xff]  ;;  %v1453_v11 = vld [vmem:[#allocation6 + $0x208] sm:$0xff] }
 0x170   :  { %3431 = vmatpush1.bf16.msra.mxu1 %v4211_v58  ;;  %3511 = vmatpush1.bf16.msra.mxu0 %v4251_v59  ;;  %v1441_v58 = vld [vmem:[#allocation6 + $0x1a8] sm:$0xff]  ;;  %v4267_v59 = vcombine.low %v1428_v47, %v1432_v48  ;;  %v4280_v47 = vcombine.high %v1484_v38, %v1488_v39 }
 0x171   :  { %3433 = vmatprep.subr.bf16.mxu1 %v4212_v60  ;;  %3513 = vmatprep.subr.bf16.mxu0 %v4252_v61  ;;  %v4331_v60 = vcombine.low %v1429_v49, %v1433_v50  ;;  %v4268_v61 = vcombine.high %v1436_v55, %v1440_v56  ;;  %v4332_v62 = vcombine.high %v1437_v57, %v1441_v58  ;;  %v1492_v49 = vld [vmem:[#allocation6 + $0x340] sm:$0xff] }
 0x172   :  { %v1496_v50 = vld [vmem:[#allocation6 + $0x360] sm:$0xff] }
 0x174   :  { %3435 = vmatpush1.bf16.msra.mxu1 %v4213_v4  ;;  %3515 = vmatpush1.bf16.msra.mxu0 %v4253_v44  ;;  %v1449_v4 = vld [vmem:[#allocation6 + $0x1e8] sm:$0xff]  ;;  %v4269_v44 = vcombine.low %v1436_v55, %v1440_v56  ;;  %v4282_v55 = vcombine.high %v1492_v49, %v1496_v50 }
 0x175   :  { %3437 = vmatprep.subr.bf16.mxu1 %v4214_v5  ;;  %3517 = vmatprep.subr.bf16.mxu0 %v4254_v8  ;;  %v4333_v5 = vcombine.low %v1437_v57, %v1441_v58  ;;  %v4270_v8 = vcombine.high %v1444_v63, %v1448_v2  ;;  %v4334_v23 = vcombine.high %v1445_v3, %v1449_v4  ;;  %v1500_v57 = vld [vmem:[#allocation6 + $0x380] sm:$0xff] }
 0x176   :  { %v1504_v58 = vld [vmem:[#allocation6 + $0x3a0] sm:$0xff] }
 0x178   :  { %3439 = vmatpush1.bf16.msra.mxu1 %v4215_v12  ;;  %3519 = vmatpush1.bf16.msra.mxu0 %v4255_v13  ;;  %v1457_v12 = vld [vmem:[#allocation6 + $0x228] sm:$0xff]  ;;  %v4271_v13 = vcombine.low %v1444_v63, %v1448_v2  ;;  %v4284_v63 = vcombine.high %v1500_v57, %v1504_v58 }
 0x179   :  { %3521 = vmatprep.subr.bf16.mxu1 %v4256_v14  ;;  %3649 = vmatprep.subr.bf16.mxu0 %v4320_v1  ;;  %v4335_v14 = vcombine.low %v1445_v3, %v1449_v4  ;;  %v4272_v1 = vcombine.high %v1452_v9, %v1456_v10  ;;  %v4336_v15 = vcombine.high %v1453_v11, %v1457_v12  ;;  %v1508_v3 = vld [vmem:[#allocation6 + $0x3c0] sm:$0xff] }
 0x17a   :  { %v1512_v4 = vld [vmem:[#allocation6 + $0x3e0] sm:$0xff] }
 0x17b   :  { %2987 = vmatmul.mubr.msk.f32.vlgmr.msra.gmra.mrb[2].mxu1 %vm762_vm9, %v4902_v45  ;;  %2988 = vmatmul.mubr.msk.f32.vlgmr.msra.gmra.mrb[4].mxu0 %vm762_vm9, %v4902_v45  ;;  %v4326_v45 = vcombine.high %v1413_v32, %v1417_v33  ;;  %v1480_v32 = vld [vmem:[#allocation6 + $0x2e0] sm:$0xff]  ;;  %v1477_v33 = vld [vmem:[#allocation6 + $0x2c8] sm:$0xff] }
 0x17c   :  { %3523 = vmatpush1.bf16.msra.mxu1 %v4257_v19  ;;  %3651 = vmatpush1.bf16.msra.mxu0 %v4321_v20  ;;  %v1465_v19 = vld [vmem:[#allocation6 + $0x268] sm:$0xff]  ;;  %v4273_v20 = vcombine.low %v1452_v9, %v1456_v10  ;;  %v4286_v9 = vcombine.high %v1508_v3, %v1512_v4 }
 0x17d   :  { %3525 = vmatprep.subr.bf16.mxu1 %v4258_v21  ;;  %3653 = vmatprep.subr.bf16.mxu0 %v4322_v22  ;;  %v4337_v21 = vcombine.low %v1453_v11, %v1457_v12  ;;  %v4274_v22 = vcombine.high %v1460_v16, %v1464_v17  ;;  %v4338_v7 = vcombine.high %v1461_v18, %v1465_v19  ;;  %v1516_v11 = vld [vmem:[#allocation6 + $0x400] sm:$0xff] }
 0x17e   :  { %v1520_v12 = vld [vmem:[#allocation6 + $0x420] sm:$0xff] }
 0x180   :  { %3527 = vmatpush1.bf16.msra.mxu1 %v4259_v26  ;;  %3655 = vmatpush1.bf16.msra.mxu0 %v4323_v27  ;;  %v1473_v26 = vld [vmem:[#allocation6 + $0x2a8] sm:$0xff]  ;;  %v4275_v27 = vcombine.low %v1460_v16, %v1464_v17  ;;  %v4288_v16 = vcombine.high %v1516_v11, %v1520_v12 }
 0x181   :  { %3529 = vmatprep.subr.bf16.mxu1 %v4260_v28  ;;  %3657 = vmatprep.subr.bf16.mxu0 %v4324_v29  ;;  %v4339_v28 = vcombine.low %v1461_v18, %v1465_v19  ;;  %v4276_v29 = vcombine.high %v1468_v24, %v1472_v0  ;;  %v4340_v30 = vcombine.high %v1469_v25, %v1473_v26  ;;  %v1524_v18 = vld [vmem:[#allocation6 + $0x440] sm:$0xff] }
 0x182   :  { %v1528_v19 = vld [vmem:[#allocation6 + $0x460] sm:$0xff] }
 0x184   :  { %3531 = vmatpush1.bf16.msra.mxu1 %v4261_v34  ;;  %3659 = vmatpush1.bf16.msra.mxu0 %v4325_v35  ;;  %v1481_v34 = vld [vmem:[#allocation6 + $0x2e8] sm:$0xff]  ;;  %v4277_v35 = vcombine.low %v1468_v24, %v1472_v0  ;;  %v4928_v24 = vld [vmem:[%s5110_s2 + $0x10] sm:$0xff]  ;;  %v4290_v0 = vcombine.high %v1524_v18, %v1528_v19 }
 0x185   :  { %3533 = vmatprep.subr.bf16.mxu1 %v4262_v36  ;;  %3661 = vmatprep.subr.bf16.mxu0 %v4326_v45  ;;  %v4341_v36 = vcombine.low %v1469_v25, %v1473_v26  ;;  %v4278_v45 = vcombine.high %v1476_v31, %v1480_v32  ;;  %v4342_v37 = vcombine.high %v1477_v33, %v1481_v34  ;;  %v1532_v26 = vld [vmem:[#allocation6 + $0x480] sm:$0xff] }
 0x188   :  { %3535 = vmatpush1.bf16.msra.mxu1 %v4263_v41  ;;  %3663 = vmatpush1.bf16.msra.mxu0 %v4327_v42  ;;  %v1489_v41 = vld [vmem:[#allocation6 + $0x328] sm:$0xff]  ;;  %v4921_v42 = vld [vmem:[%s5110_s2 + $0x18] sm:$0xff] }
 0x189   :  { %3537 = vmatprep.subr.bf16.mxu1 %v4264_v43  ;;  %3665 = vmatprep.subr.bf16.mxu0 %v4328_v46  ;;  %v4279_v43 = vcombine.low %v1476_v31, %v1480_v32  ;;  %v4343_v46 = vcombine.low %v1477_v33, %v1481_v34  ;;  %v4344_v48 = vcombine.high %v1485_v40, %v1489_v41  ;;  %v1540_v34 = vld [vmem:[#allocation6 + $0x4c0] sm:$0xff] }
 0x18a   :  { %2262 = vmatprep.mubr.f32.mxu1 %v4921_v42  ;;  %2404 = vmatprep.mubr.f32.mxu0 %v4921_v42 }
 0x18c   :  { %3539 = vmatpush1.bf16.msra.mxu1 %v4265_v51  ;;  %3667 = vmatpush1.bf16.msra.mxu0 %v4329_v52  ;;  %v1493_v51 = vld [vmem:[#allocation6 + $0x348] sm:$0xff] }
 0x18d   :  { %3541 = vmatprep.subr.bf16.mxu1 %v4266_v53  ;;  %3669 = vmatprep.subr.bf16.mxu0 %v4330_v54  ;;  %v1497_v52 = vld [vmem:[#allocation6 + $0x368] sm:$0xff]  ;;  %v4281_v53 = vcombine.low %v1484_v38, %v1488_v39  ;;  %v4345_v54 = vcombine.low %v1485_v40, %v1489_v41  ;;  %v1548_v41 = vld [vmem:[#allocation6 + $0x500] sm:$0xff] }
 0x18e   :  { %v4346_v56 = vcombine.high %v1493_v51, %v1497_v52 }
 0x190   :  { %3543 = vmatpush1.bf16.msra.mxu1 %v4267_v59  ;;  %3671 = vmatpush1.bf16.msra.mxu0 %v4331_v60  ;;  %v1501_v59 = vld [vmem:[#allocation6 + $0x388] sm:$0xff] }
 0x191   :  { %3545 = vmatprep.subr.bf16.mxu1 %v4268_v61  ;;  %3673 = vmatprep.subr.bf16.mxu0 %v4332_v62  ;;  %v1505_v60 = vld [vmem:[#allocation6 + $0x3a8] sm:$0xff]  ;;  %v4283_v61 = vcombine.low %v1492_v49, %v1496_v50  ;;  %v4347_v62 = vcombine.low %v1493_v51, %v1497_v52  ;;  %v1556_v52 = vld [vmem:[#allocation6 + $0x540] sm:$0xff] }
 0x192   :  { %v4348_v2 = vcombine.high %v1501_v59, %v1505_v60 }
 0x194   :  { %3547 = vmatpush1.bf16.msra.mxu1 %v4269_v44  ;;  %3675 = vmatpush1.bf16.msra.mxu0 %v4333_v5  ;;  %v1509_v44 = vld [vmem:[#allocation6 + $0x3c8] sm:$0xff] }
 0x195   :  { %3549 = vmatprep.subr.bf16.mxu1 %v4270_v8  ;;  %3677 = vmatprep.subr.bf16.mxu0 %v4334_v23  ;;  %v1513_v5 = vld [vmem:[#allocation6 + $0x3e8] sm:$0xff]  ;;  %v4285_v8 = vcombine.low %v1500_v57, %v1504_v58  ;;  %v4349_v23 = vcombine.low %v1501_v59, %v1505_v60  ;;  %v1564_v60 = vld [vmem:[#allocation6 + $0x580] sm:$0xff] }
 0x196   :  { %v4350_v10 = vcombine.high %v1509_v44, %v1513_v5 }
 0x198   :  { %3551 = vmatpush1.bf16.msra.mxu1 %v4271_v13  ;;  %3679 = vmatpush1.bf16.msra.mxu0 %v4335_v14  ;;  %v1517_v13 = vld [vmem:[#allocation6 + $0x408] sm:$0xff] }
 0x199   :  { %3553 = vmatprep.subr.bf16.mxu1 %v4272_v1  ;;  %3681 = vmatprep.subr.bf16.mxu0 %v4336_v15  ;;  %v1521_v14 = vld [vmem:[#allocation6 + $0x428] sm:$0xff]  ;;  %v4287_v1 = vcombine.low %v1508_v3, %v1512_v4  ;;  %v4351_v15 = vcombine.low %v1509_v44, %v1513_v5  ;;  %v1572_v5 = vld [vmem:[#allocation6 + $0x5c0] sm:$0xff] }
 0x19a   :  { %v4352_v17 = vcombine.high %v1517_v13, %v1521_v14 }
 0x19c   :  { %3555 = vmatpush1.bf16.msra.mxu1 %v4273_v20  ;;  %3683 = vmatpush1.bf16.msra.mxu0 %v4337_v21  ;;  %v1525_v20 = vld [vmem:[#allocation6 + $0x448] sm:$0xff] }
 0x19d   :  { %3557 = vmatprep.subr.bf16.mxu1 %v4274_v22  ;;  %3685 = vmatprep.subr.bf16.mxu0 %v4338_v7  ;;  %v1529_v21 = vld [vmem:[#allocation6 + $0x468] sm:$0xff]  ;;  %v4289_v22 = vcombine.low %v1516_v11, %v1520_v12  ;;  %v4353_v7 = vcombine.low %v1517_v13, %v1521_v14  ;;  %v1580_v14 = vld [vmem:[#allocation6 + $0x600] sm:$0xff] }
 0x19e   :  { %v4354_v25 = vcombine.high %v1525_v20, %v1529_v21  ;;  %v4355_v31 = vcombine.low %v1525_v20, %v1529_v21  ;;  %v1588_v21 = vld [vmem:[#allocation6 + $0x640] sm:$0xff] }
 0x1a0   :  { %3559 = vmatpush1.bf16.msra.mxu1 %v4275_v27  ;;  %3687 = vmatpush1.bf16.msra.mxu0 %v4339_v28  ;;  %v1536_v27 = vld [vmem:[#allocation6 + $0x4a0] sm:$0xff]  ;;  %v1533_v28 = vld [vmem:[#allocation6 + $0x488] sm:$0xff] }
 0x1a1   :  { %3561 = vmatprep.subr.bf16.mxu1 %v4276_v29  ;;  %3689 = vmatprep.subr.bf16.mxu0 %v4340_v30  ;;  %v1537_v29 = vld [vmem:[#allocation6 + $0x4a8] sm:$0xff]  ;;  %v4291_v30 = vcombine.low %v1524_v18, %v1528_v19  ;;  %v4292_v32 = vcombine.high %v1532_v26, %v1536_v27 }
 0x1a2   :  { %v4356_v33 = vcombine.high %v1533_v28, %v1537_v29  ;;  %v4357_v38 = vcombine.low %v1533_v28, %v1537_v29  ;;  %v1596_v29 = vld [vmem:[#allocation6 + $0x680] sm:$0xff] }
 0x1a4   :  { %3563 = vmatpush1.bf16.msra.mxu1 %v4277_v35  ;;  %3691 = vmatpush1.bf16.msra.mxu0 %v4341_v36  ;;  %v1544_v35 = vld [vmem:[#allocation6 + $0x4e0] sm:$0xff]  ;;  %v1541_v36 = vld [vmem:[#allocation6 + $0x4c8] sm:$0xff] }
 0x1a5   :  { %3565 = vmatprep.subr.bf16.mxu1 %v4278_v45  ;;  %3693 = vmatprep.subr.bf16.mxu0 %v4342_v37  ;;  %v1545_v45 = vld [vmem:[#allocation6 + $0x4e8] sm:$0xff]  ;;  %v4293_v37 = vcombine.low %v1532_v26, %v1536_v27  ;;  %v4294_v39 = vcombine.high %v1540_v34, %v1544_v35 }
 0x1a6   :  { %v4358_v40 = vcombine.high %v1541_v36, %v1545_v45  ;;  %v4359_v49 = vcombine.low %v1541_v36, %v1545_v45  ;;  %v1604_v45 = vld [vmem:[#allocation6 + $0x6c0] sm:$0xff] }
 0x1a8   :  { %3567 = vmatpush1.bf16.msra.mxu1 %v4279_v43  ;;  %3695 = vmatpush1.bf16.msra.mxu0 %v4343_v46  ;;  %v1552_v43 = vld [vmem:[#allocation6 + $0x520] sm:$0xff]  ;;  %v1549_v46 = vld [vmem:[#allocation6 + $0x508] sm:$0xff] }
 0x1a9   :  { %3569 = vmatprep.subr.bf16.mxu1 %v4280_v47  ;;  %3697 = vmatprep.subr.bf16.mxu0 %v4344_v48  ;;  %v1553_v47 = vld [vmem:[#allocation6 + $0x528] sm:$0xff]  ;;  %v4295_v48 = vcombine.low %v1540_v34, %v1544_v35  ;;  %v4296_v50 = vcombine.high %v1548_v41, %v1552_v43 }
 0x1aa   :  { %v4360_v51 = vcombine.high %v1549_v46, %v1553_v47  ;;  %v4361_v57 = vcombine.low %v1549_v46, %v1553_v47  ;;  %v1612_v47 = vld [vmem:[#allocation6 + $0x700] sm:$0xff] }
 0x1ac   :  { %3571 = vmatpush1.bf16.msra.mxu1 %v4281_v53  ;;  %3699 = vmatpush1.bf16.msra.mxu0 %v4345_v54  ;;  %v1560_v53 = vld [vmem:[#allocation6 + $0x560] sm:$0xff]  ;;  %v1557_v54 = vld [vmem:[#allocation6 + $0x548] sm:$0xff] }
 0x1ad   :  { %3573 = vmatprep.subr.bf16.mxu1 %v4282_v55  ;;  %3701 = vmatprep.subr.bf16.mxu0 %v4346_v56  ;;  %v1561_v55 = vld [vmem:[#allocation6 + $0x568] sm:$0xff]  ;;  %v4297_v56 = vcombine.low %v1548_v41, %v1552_v43  ;;  %v4298_v58 = vcombine.high %v1556_v52, %v1560_v53 }
 0x1ae   :  { %v4362_v59 = vcombine.high %v1557_v54, %v1561_v55  ;;  %v4363_v3 = vcombine.low %v1557_v54, %v1561_v55  ;;  %v1620_v55 = vld [vmem:[#allocation6 + $0x740] sm:$0xff] }
 0x1b0   :  { %3575 = vmatpush1.bf16.msra.mxu1 %v4283_v61  ;;  %3703 = vmatpush1.bf16.msra.mxu0 %v4347_v62  ;;  %v1568_v61 = vld [vmem:[#allocation6 + $0x5a0] sm:$0xff]  ;;  %v1565_v62 = vld [vmem:[#allocation6 + $0x588] sm:$0xff] }
 0x1b1   :  { %3577 = vmatprep.subr.bf16.mxu1 %v4284_v63  ;;  %3705 = vmatprep.subr.bf16.mxu0 %v4348_v2  ;;  %v1569_v63 = vld [vmem:[#allocation6 + $0x5a8] sm:$0xff]  ;;  %v4299_v2 = vcombine.low %v1556_v52, %v1560_v53  ;;  %v4300_v4 = vcombine.high %v1564_v60, %v1568_v61 }
 0x1b2   :  { %v4364_v44 = vcombine.high %v1565_v62, %v1569_v63  ;;  %v4365_v11 = vcombine.low %v1565_v62, %v1569_v63  ;;  %v1628_v63 = vld [vmem:[#allocation6 + $0x780] sm:$0xff] }
 0x1b4   :  { %3579 = vmatpush1.bf16.msra.mxu1 %v4285_v8  ;;  %3707 = vmatpush1.bf16.msra.mxu0 %v4349_v23  ;;  %v1576_v8 = vld [vmem:[#allocation6 + $0x5e0] sm:$0xff]  ;;  %v1573_v23 = vld [vmem:[#allocation6 + $0x5c8] sm:$0xff] }
 0x1b5   :  { %3581 = vmatprep.subr.bf16.mxu1 %v4286_v9  ;;  %3709 = vmatprep.subr.bf16.mxu0 %v4350_v10  ;;  %v1577_v9 = vld [vmem:[#allocation6 + $0x5e8] sm:$0xff]  ;;  %v4301_v10 = vcombine.low %v1564_v60, %v1568_v61  ;;  %v4302_v12 = vcombine.high %v1572_v5, %v1576_v8 }
 0x1b6   :  { %v4366_v13 = vcombine.high %v1573_v23, %v1577_v9  ;;  %v4367_v18 = vcombine.low %v1573_v23, %v1577_v9  ;;  %v1640_v23 = vld [vmem:[#allocation6 + $0x7e0] sm:$0xff] }
 0x1b8   :  { %3583 = vmatpush1.bf16.msra.mxu1 %v4287_v1  ;;  %3711 = vmatpush1.bf16.msra.mxu0 %v4351_v15  ;;  %v1584_v1 = vld [vmem:[#allocation6 + $0x620] sm:$0xff]  ;;  %v1581_v15 = vld [vmem:[#allocation6 + $0x608] sm:$0xff] }
 0x1b9   :  { %3585 = vmatprep.subr.bf16.mxu1 %v4288_v16  ;;  %3713 = vmatprep.subr.bf16.mxu0 %v4352_v17  ;;  %v1585_v16 = vld [vmem:[#allocation6 + $0x628] sm:$0xff]  ;;  %v4303_v17 = vcombine.low %v1572_v5, %v1576_v8  ;;  %v4304_v19 = vcombine.high %v1580_v14, %v1584_v1  ;;  %v1636_v8 = vld [vmem:[#allocation6 + $0x7c0] sm:$0xff] }
 0x1ba   :  { %v4368_v20 = vcombine.high %v1581_v15, %v1585_v16  ;;  %v4369_v26 = vcombine.low %v1581_v15, %v1585_v16  ;;  %v4938_v15 = vld [vmem:[#allocation6 + $0x38] sm:$0xff] }
 0x1bb   :  { %2263 = vmatmul.mubr.f32.vlgmr.msra.gmra.mrb[4].mxu1 %v4928_v24  ;;  %2405 = vmatmul.mubr.f32.vlgmr.msra.gmra.mrb[6].mxu0 %v4928_v24 }
 0x1bc   :  { %3587 = vmatpush1.bf16.msra.mxu1 %v4289_v22  ;;  %3715 = vmatpush1.bf16.msra.mxu0 %v4353_v7  ;;  %v1592_v22 = vld [vmem:[#allocation6 + $0x660] sm:$0xff]  ;;  %v1589_v7 = vld [vmem:[#allocation6 + $0x648] sm:$0xff] }
 0x1bd   :  { %3589 = vmatprep.subr.bf16.mxu1 %v4290_v0  ;;  %3717 = vmatprep.subr.bf16.mxu0 %v4354_v25  ;;  %v1593_v0 = vld [vmem:[#allocation6 + $0x668] sm:$0xff]  ;;  %v4305_v25 = vcombine.low %v1580_v14, %v1584_v1  ;;  %v4306_v27 = vcombine.high %v1588_v21, %v1592_v22 }
 0x1be   :  { %v4370_v28 = vcombine.high %v1589_v7, %v1593_v0  ;;  %v4371_v34 = vcombine.low %v1589_v7, %v1593_v0  ;;  %v1637_v14 = vld [vmem:[#allocation6 + $0x7c8] sm:$0xff] }
 0x1bf   :  { %v1641_v1 = vld [vmem:[#allocation6 + $0x7e8] sm:$0xff] }
 0x1c0   :  { %3591 = vmatpush1.bf16.msra.mxu1 %v4291_v30  ;;  %3719 = vmatpush1.bf16.msra.mxu0 %v4355_v31  ;;  %v1600_v30 = vld [vmem:[#allocation6 + $0x6a0] sm:$0xff]  ;;  %v1597_v31 = vld [vmem:[#allocation6 + $0x688] sm:$0xff]  ;;  %v4383_v7 = vcombine.low %v1637_v14, %v1641_v1 }
 0x1c1   :  { %3593 = vmatprep.subr.bf16.mxu1 %v4292_v32  ;;  %3721 = vmatprep.subr.bf16.mxu0 %v4356_v33  ;;  %v1601_v32 = vld [vmem:[#allocation6 + $0x6a8] sm:$0xff]  ;;  %v4307_v33 = vcombine.low %v1588_v21, %v1592_v22  ;;  %v4308_v35 = vcombine.high %v1596_v29, %v1600_v30  ;;  %v4382_v21 = vcombine.high %v1637_v14, %v1641_v1 }
 0x1c2   :  { %v4372_v36 = vcombine.high %v1597_v31, %v1601_v32  ;;  %v4373_v41 = vcombine.low %v1597_v31, %v1601_v32  ;;  %v4319_v22 = vcombine.low %v1636_v8, %v1640_v23  ;;  %v720_v31 = vld [vmem:[%s5113_s5] sm:$0xff]  ;;  %v732_v32 = vsub.s32 2, %v4759_v6 }
 0x1c4   :  { %3595 = vmatpush1.bf16.msra.mxu1 %v4293_v37  ;;  %3723 = vmatpush1.bf16.msra.mxu0 %v4357_v38  ;;  %v1608_v37 = vld [vmem:[#allocation6 + $0x6e0] sm:$0xff]  ;;  %v1605_v38 = vld [vmem:[#allocation6 + $0x6c8] sm:$0xff] }
 0x1c5   :  { %3597 = vmatprep.subr.bf16.mxu1 %v4294_v39  ;;  %3725 = vmatprep.subr.bf16.mxu0 %v4358_v40  ;;  %v1609_v39 = vld [vmem:[#allocation6 + $0x6e8] sm:$0xff]  ;;  %v4309_v40 = vcombine.low %v1596_v29, %v1600_v30  ;;  %v4310_v43 = vcombine.high %v1604_v45, %v1608_v37  ;;  %v724_v30 = vsub.s32 0, %v4759_v6 }
 0x1c6   :  { %v4374_v46 = vcombine.high %v1605_v38, %v1609_v39  ;;  %v4375_v52 = vcombine.low %v1605_v38, %v1609_v39 }
 0x1c8   :  { %3599 = vmatpush1.bf16.msra.mxu1 %v4295_v48  ;;  %3727 = vmatpush1.bf16.msra.mxu0 %v4359_v49  ;;  %v1616_v48 = vld [vmem:[#allocation6 + $0x720] sm:$0xff]  ;;  %v1613_v49 = vld [vmem:[#allocation6 + $0x708] sm:$0xff] }
 0x1c9   :  { %3601 = vmatprep.subr.bf16.mxu1 %v4296_v50  ;;  %3729 = vmatprep.subr.bf16.mxu0 %v4360_v51  ;;  %v1617_v50 = vld [vmem:[#allocation6 + $0x728] sm:$0xff]  ;;  %v4311_v51 = vcombine.low %v1604_v45, %v1608_v37  ;;  %v4312_v53 = vcombine.high %v1612_v47, %v1616_v48 }
 0x1ca   :  { %v4376_v54 = vcombine.high %v1613_v49, %v1617_v50  ;;  %v4377_v60 = vcombine.low %v1613_v49, %v1617_v50 }
 0x1cc   :  { %3603 = vmatpush1.bf16.msra.mxu1 %v4297_v56  ;;  %3731 = vmatpush1.bf16.msra.mxu0 %v4361_v57  ;;  %v1624_v56 = vld [vmem:[#allocation6 + $0x760] sm:$0xff]  ;;  %v1621_v57 = vld [vmem:[#allocation6 + $0x748] sm:$0xff] }
 0x1cd   :  { %3605 = vmatprep.subr.bf16.mxu1 %v4298_v58  ;;  %3733 = vmatprep.subr.bf16.mxu0 %v4362_v59  ;;  %v1625_v58 = vld [vmem:[#allocation6 + $0x768] sm:$0xff]  ;;  %v4313_v59 = vcombine.low %v1612_v47, %v1616_v48  ;;  %v4314_v61 = vcombine.high %v1620_v55, %v1624_v56 }
 0x1ce   :  { %v4378_v62 = vcombine.high %v1621_v57, %v1625_v58  ;;  %v4379_v5 = vcombine.low %v1621_v57, %v1625_v58 }
 0x1d0   :  { %3607 = vmatpush1.bf16.msra.mxu1 %v4299_v2  ;;  %3735 = vmatpush1.bf16.msra.mxu0 %v4363_v3  ;;  %v1632_v2 = vld [vmem:[#allocation6 + $0x7a0] sm:$0xff]  ;;  %v1629_v3 = vld [vmem:[#allocation6 + $0x788] sm:$0xff] }
 0x1d1   :  { %3609 = vmatprep.subr.bf16.mxu1 %v4300_v4  ;;  %3737 = vmatprep.subr.bf16.mxu0 %v4364_v44  ;;  %v1633_v4 = vld [vmem:[#allocation6 + $0x7a8] sm:$0xff]  ;;  %v4315_v44 = vcombine.low %v1620_v55, %v1624_v56  ;;  %v4316_v9 = vcombine.high %v1628_v63, %v1632_v2  ;;  %v752_v55 = vsub.s32 7, %v4759_v6 }
 0x1d4   :  { %3611 = vmatpush1.bf16.msra.mxu1 %v4301_v10  ;;  %3739 = vmatpush1.bf16.msra.mxu0 %v4365_v11  ;;  %v4380_v10 = vcombine.high %v1629_v3, %v1633_v4  ;;  %v4932_v11 = vld [vmem:[#allocation6 + $0x10] sm:$0xff] }
 0x1d5   :  { %3613 = vmatprep.subr.bf16.mxu1 %v4302_v12  ;;  %3741 = vmatprep.subr.bf16.mxu0 %v4366_v13  ;;  %v4934_v12 = vld [vmem:[#allocation6 + $0x30] sm:$0xff]  ;;  %v4936_v13 = vld [vmem:[#allocation6 + $0x18] sm:$0xff] }
 0x1d6   :  { %v4385_v16 = vcombine.low %v4932_v11, %v4934_v12  ;;  %v4384_v0 = vcombine.high %v4932_v11, %v4934_v12 }
 0x1d8   :  { %3615 = vmatpush1.bf16.msra.mxu1 %v4303_v17  ;;  %3743 = vmatpush1.bf16.msra.mxu0 %v4367_v18  ;;  %v4449_v17 = vcombine.low %v4936_v13, %v4938_v15  ;;  %v4317_v18 = vcombine.low %v1628_v63, %v1632_v2  ;;  %v753_v2 = vrot.slane %v720_v31, %v752_v55 }
 0x1d9   :  { %3617 = vmatprep.subr.bf16.mxu1 %v4304_v19  ;;  %3745 = vmatprep.subr.bf16.mxu0 %v4368_v20  ;;  %v4381_v19 = vcombine.low %v1629_v3, %v1633_v4  ;;  %v4318_v20 = vcombine.high %v1636_v8, %v1640_v23 }
 0x1dc   :  { %3619 = vmatpush1.bf16.msra.mxu1 %v4305_v25  ;;  %3747 = vmatpush1.bf16.msra.mxu0 %v4369_v26  ;;  %v4448_v25 = vcombine.high %v4936_v13, %v4938_v15 }
 0x1dd   :  { %3621 = vmatprep.subr.bf16.mxu1 %v4306_v27  ;;  %3749 = vmatprep.subr.bf16.mxu0 %v4370_v28 }
 0x1e0   :  { %3623 = vmatpush1.bf16.msra.mxu1 %v4307_v33  ;;  %3751 = vmatpush1.bf16.msra.mxu0 %v4371_v34  ;;  %v728_v33 = vsub.s32 1, %v4759_v6  ;;  %v736_v34 = vsub.s32 3, %v4759_v6 }
 0x1e1   :  { %3625 = vmatprep.subr.bf16.mxu1 %v4308_v35  ;;  %3753 = vmatprep.subr.bf16.mxu0 %v4372_v36  ;;  %v725_v35 = vrot.slane %v720_v31, %v724_v30  ;;  %v733_v36 = vrot.slane %v720_v31, %v732_v32 }
 0x1e2   :  { %v729_v45 = vrot.slane %v720_v31, %v728_v33  ;;  %v737_v37 = vrot.slane %v720_v31, %v736_v34 }
 0x1e4   :  { %3627 = vmatpush1.bf16.msra.mxu1 %v4309_v40  ;;  %3755 = vmatpush1.bf16.msra.mxu0 %v4373_v41 }
 0x1e5   :  { %3629 = vmatprep.subr.bf16.mxu1 %v4310_v43  ;;  %3757 = vmatprep.subr.bf16.mxu0 %v4374_v46 }
 0x1e8   :  { %3631 = vmatpush1.bf16.msra.mxu1 %v4311_v51  ;;  %3759 = vmatpush1.bf16.msra.mxu0 %v4375_v52  ;;  %v740_v51 = vsub.s32 4, %v4759_v6  ;;  %v748_v52 = vsub.s32 6, %v4759_v6 }
 0x1e9   :  { %3633 = vmatprep.subr.bf16.mxu1 %v4312_v53  ;;  %3761 = vmatprep.subr.bf16.mxu0 %v4376_v54  ;;  %v744_v54 = vsub.s32 5, %v4759_v6 }
 0x1eb   :  { %v745_v63 = vrot.slane %v720_v31, %v744_v54 }
 0x1ec   :  { %3635 = vmatpush1.bf16.msra.mxu1 %v4313_v59  ;;  %3763 = vmatpush1.bf16.msra.mxu0 %v4377_v60  ;;  %v741_v60 = vrot.slane %v720_v31, %v740_v51 }
 0x1ed   :  { %3637 = vmatprep.subr.bf16.mxu1 %v4314_v61  ;;  %3765 = vmatprep.subr.bf16.mxu0 %v4378_v62  ;;  %v749_v61 = vrot.slane %v720_v31, %v748_v52 }
 0x1f0   :  { %3639 = vmatpush1.bf16.msra.mxu1 %v4315_v44  ;;  %3767 = vmatpush1.bf16.msra.mxu0 %v4379_v5 }
 0x1f1   :  { %3641 = vmatprep.subr.bf16.mxu1 %v4316_v9  ;;  %3769 = vmatprep.subr.bf16.mxu0 %v4380_v10 }
 0x1f4   :  { %3643 = vmatpush1.bf16.msra.mxu1 %v4317_v18  ;;  %3771 = vmatpush1.bf16.msra.mxu0 %v4381_v19 }
 0x1f5   :  { %3645 = vmatprep.subr.bf16.mxu1 %v4318_v20  ;;  %3773 = vmatprep.subr.bf16.mxu0 %v4382_v21  ;;  %v82_v21 = vld [vmem:[%s5111_s3] sm:$0xff] }
 0x1f8   :  { %3647 = vmatpush1.bf16.msra.mxu1 %v4319_v22  ;;  %3775 = vmatpush1.bf16.msra.mxu0 %v4383_v7  ;;  %v83_v7 = vld [vmem:[%s5111_s3 + $0x8] sm:$0xff] }
 0x1f9   :  { %3777 = vmatprep.subr.bf16.mxu1 %v4384_v0  ;;  %3905 = vmatprep.subr.bf16.mxu0 %v4448_v25 }
 0x1fe   :  { %v903_v26 = vpop.f32.mrb[0].mxu1  ;;  %v1045_v27 = vpop.f32.mrb[2].mxu0 }
 0x1ff   :  { %v905_v28 = vpop.f32.mrb[1].mxu1  ;;  %v1047_v29 = vpop.f32.mrb[3].mxu0  ;;  %v4064_v38 = vadd.f32 %v903_v26, %v725_v35  ;;  %v4066_v39 = vadd.f32 %v1045_v27, %v733_v36 }
 0x200   :  { %v4065_v40 = vadd.f32 %v905_v28, %v729_v45  ;;  %v4067_v41 = vadd.f32 %v1047_v29, %v737_v37 }
 0x201   :  { %v2989_v43 = vmul.f32 -1.442695, %v4064_v38  ;;  %v2991_v46 = vmul.f32 -1.442695, %v4066_v39 }
 0x202   :  { %v2990_v47 = vmul.f32 -1.442695, %v4065_v40  ;;  %v2992_v48 = vmul.f32 -1.442695, %v4067_v41  ;;  %v1398_v41 = vld [vmem:[#allocation6 + $0x50] sm:$0xff] }
 0x203   :  { %4520 = vpow2.f32 %v2989_v43 }
 0x204   :  { %4522 = vpow2.f32 %v2991_v46 }
 0x205   :  { %4524 = vpow2.f32 %v2990_v47  ;;  %v1402_v47 = vld [vmem:[#allocation6 + $0x70] sm:$0xff] }
 0x206   :  { %4526 = vpow2.f32 %v2992_v48  ;;  %v1399_v48 = vld [vmem:[#allocation6 + $0x58] sm:$0xff] }
 0x20d   :  { %v4521_v49 = vpop.eup %4520 }
 0x20e   :  { %v4523_v50 = vpop.eup %4522  ;;  %v1340_v57 = vadd.f32 1.0, %v4521_v49  ;;  %v1403_v49 = vld [vmem:[#allocation6 + $0x78] sm:$0xff] }
 0x20f   :  { %v4525_v53 = vpop.eup %4524  ;;  %v1352_v58 = vadd.f32 1.0, %v4523_v50 }
 0x210   :  { %v4527_v56 = vpop.eup %4526  ;;  %v1341_v59 = vadd.f32 1.0, %v4525_v53  ;;  %4528 = vrcp.f32 %v1340_v57  ;;  %v4450_v57 = vcombine.high %v1399_v48, %v1403_v49 }
 0x211   :  { %v1353_v62 = vadd.f32 1.0, %v4527_v56  ;;  %4530 = vrcp.f32 %v1352_v58  ;;  %v4386_v56 = vcombine.high %v1398_v41, %v1402_v47  ;;  %v1406_v58 = vld [vmem:[#allocation6 + $0x90] sm:$0xff] }
 0x212   :  { %4532 = vrcp.f32 %v1341_v59  ;;  %v1410_v59 = vld [vmem:[#allocation6 + $0xb0] sm:$0xff] }
 0x213   :  { %4534 = vrcp.f32 %v1353_v62  ;;  %v4387_v62 = vcombine.low %v1398_v41, %v1402_v47  ;;  %v4389_v11 = vcombine.low %v1406_v58, %v1410_v59 }
 0x21a   :  { %v4529_v18 = vpop.eup %4528 }
 0x21b   :  { %v4531_v19 = vpop.eup %4530 }
 0x21c   :  { %v4533_v20 = vpop.eup %4532  ;;  %v1372_v26 = vmul.f32 %v4531_v19, %v82_v21  ;;  %v1434_v19 = vld [vmem:[#allocation6 + $0x170] sm:$0xff]  ;;  %v1435_v21 = vld [vmem:[#allocation6 + $0x178] sm:$0xff] }
 0x21d   :  { %v4535_v22 = vpop.eup %4534 }
 0x21e   :  { %v1373_v29 = vmul.f32 %v4535_v22, %v83_v7 }
 0x24e   :  { %v1187_v3 = vpop.f32.mrb[2].mxu1  ;;  %v1329_v4 = vpop.f32.mrb[4].mxu0 }
 0x24f   :  { %v4068_v44 = vadd.f32 %v1187_v3, %v741_v60  ;;  %v4070_v5 = vadd.f32 %v1329_v4, %v749_v61  ;;  %v1189_v8 = vpop.f32.mrb[3].mxu1  ;;  %v1331_v23 = vpop.f32.mrb[5].mxu0  ;;  %v1407_v60 = vld [vmem:[#allocation6 + $0x98] sm:$0xff]  ;;  %v1414_v4 = vld [vmem:[#allocation6 + $0xd0] sm:$0xff] }
 0x250   :  { %v4069_v9 = vadd.f32 %v1189_v8, %v745_v63  ;;  %v4071_v10 = vadd.f32 %v1331_v23, %v753_v2  ;;  %v1411_v61 = vld [vmem:[#allocation6 + $0xb8] sm:$0xff]  ;;  %v4451_v63 = vcombine.low %v1399_v48, %v1403_v49  ;;  %v4388_v2 = vcombine.high %v1406_v58, %v1410_v59  ;;  %v1454_v49 = vld [vmem:[#allocation6 + $0x210] sm:$0xff] }
 0x251   :  { %4536 = vtanh.f32 %v4068_v44  ;;  %v2993_v14 = vmul.f32 -1.442695, %v4070_v5  ;;  %v4452_v3 = vcombine.high %v1407_v60, %v1411_v61  ;;  %v1418_v44 = vld [vmem:[#allocation6 + $0xf0] sm:$0xff]  ;;  %v1415_v5 = vld [vmem:[#allocation6 + $0xd8] sm:$0xff]  ;;  %v4453_v12 = vcombine.low %v1407_v60, %v1411_v61 }
 0x252   :  { %4538 = vtanh.f32 %v4069_v9  ;;  %v2994_v1 = vmul.f32 -1.442695, %v4071_v10  ;;  %v1419_v8 = vld [vmem:[#allocation6 + $0xf8] sm:$0xff]  ;;  %v4390_v13 = vcombine.high %v1414_v4, %v1418_v44  ;;  %v4391_v10 = vcombine.low %v1414_v4, %v1418_v44 }
 0x253   :  { %4540 = vpow2.f32 %v2993_v14  ;;  %v4454_v15 = vcombine.high %v1415_v5, %v1419_v8  ;;  %v1423_v23 = vld [vmem:[#allocation6 + $0x118] sm:$0xff]  ;;  %v4455_v14 = vcombine.low %v1415_v5, %v1419_v8 }
 0x254   :  { %4542 = vpow2.f32 %v2994_v1  ;;  %v1427_v9 = vld [vmem:[#allocation6 + $0x138] sm:$0xff] }
 0x255   :  { %v4457_v7 = vcombine.low %v1423_v23, %v1427_v9 }
 0x25b   :  { %v4537_v0 = vpop.eup %4536 }
 0x25c   :  { %v4539_v25 = vpop.eup %4538  ;;  %v1374_v27 = vmul.f32 %v4537_v0, %v4529_v18  ;;  %v1430_v18 = vld [vmem:[#allocation6 + $0x150] sm:$0xff] }
 0x25d   :  { %v4541_v28 = vpop.eup %4540  ;;  %v1375_v31 = vmul.f32 %v4539_v25, %v4533_v20  ;;  %v1431_v20 = vld [vmem:[#allocation6 + $0x158] sm:$0xff]  ;;  %v4394_v0 = vcombine.high %v1430_v18, %v1434_v19 }
 0x25e   :  { %v4543_v35 = vpop.eup %4542  ;;  %v1376_v36 = vadd.f32 %v1374_v27, %v1372_v26  ;;  %v1366_v45 = vadd.f32 1.0, %v4541_v28  ;;  %v4458_v25 = vcombine.high %v1431_v20, %v1435_v21  ;;  %v1438_v26 = vld [vmem:[#allocation6 + $0x190] sm:$0xff]  ;;  %v1439_v28 = vld [vmem:[#allocation6 + $0x198] sm:$0xff] }
 0x25f   :  { %v1377_v37 = vadd.f32 %v1375_v31, %v1373_v29  ;;  %v1367_v38 = vadd.f32 1.0, %v4543_v35  ;;  %v1442_v27 = vld [vmem:[#allocation6 + $0x1b0] sm:$0xff]  ;;  %v1443_v29 = vld [vmem:[#allocation6 + $0x1b8] sm:$0xff]  ;;  %v4395_v31 = vcombine.low %v1430_v18, %v1434_v19  ;;  %v4459_v35 = vcombine.low %v1431_v20, %v1435_v21 }
 0x260   :  { %4544 = vtanh.f32 %v1376_v36  ;;  %2958 = vst [vmem:[%s5120_s12] sm:$0xff] %v1376_v36  ;;  %v4396_v36 = vcombine.high %v1438_v26, %v1442_v27  ;;  %v4397_v41 = vcombine.low %v1438_v26, %v1442_v27 }
 0x261   :  { %4546 = vrcp.f32 %v1366_v45  ;;  %2959 = vst [vmem:[%s5120_s12 + $0x8] sm:$0xff] %v1377_v37  ;;  %v4460_v45 = vcombine.high %v1439_v28, %v1443_v29 }
 0x262   :  { %4548 = vtanh.f32 %v1377_v37  ;;  %v1446_v37 = vld [vmem:[#allocation6 + $0x1d0] sm:$0xff] }
 0x263   :  { %4550 = vrcp.f32 %v1367_v38  ;;  %v1450_v38 = vld [vmem:[#allocation6 + $0x1f0] sm:$0xff] }
 0x264   :  { %v4398_v47 = vcombine.high %v1446_v37, %v1450_v38  ;;  %v4399_v58 = vcombine.low %v1446_v37, %v1450_v38 }
 0x26a   :  { %v4545_v39 = vpop.eup %4544 }
 0x26b   :  { %v4547_v40 = vpop.eup %4546 }
 0x26c   :  { %v4549_v43 = vpop.eup %4548  ;;  %v4987_v46 = vmul.f32 %v4547_v40, %v4545_v39  ;;  %v1447_v39 = vld [vmem:[#allocation6 + $0x1d8] sm:$0xff] }
 0x26d   :  { %v4551_v50 = vpop.eup %4550  ;;  %v1451_v40 = vld [vmem:[#allocation6 + $0x1f8] sm:$0xff] }
 0x26e   :  { %v4989_v53 = vmul.f32 %v4551_v50, %v4549_v43  ;;  %2956 = vst [vmem:[%s5119_s11] sm:$0xff] %v4987_v46  ;;  %v4461_v43 = vcombine.low %v1439_v28, %v1443_v29  ;;  %v4462_v48 = vcombine.high %v1447_v39, %v1451_v40  ;;  %v1458_v50 = vld [vmem:[#allocation6 + $0x230] sm:$0xff]  ;;  %v4463_v59 = vcombine.low %v1447_v39, %v1451_v40 }
 0x26f   :  { %v4400_v60 = vcombine.high %v1454_v49, %v1458_v50  ;;  %v4401_v4 = vcombine.low %v1454_v49, %v1458_v50 }
 0x270   :  { %2333 = vmatprep.mubr.f32.mxu1 %v4989_v53  ;;  %2957 = vst [vmem:[%s5119_s11 + $0x8] sm:$0xff] %v4989_v53  ;;  %2475 = vmatprep.mubr.f32.mxu0 %v4989_v53 }
 0x271   :  { %2334 = vmatmul.mubr.f32.vlgmr.msra.gmra.mrb[4].mxu1 %v4987_v46  ;;  %2476 = vmatmul.mubr.f32.vlgmr.msra.gmra.mrb[6].mxu0 %v4987_v46 }
 0x272   :  { %3779 = vmatpush1.bf16.msra.mxu1 %v4385_v16  ;;  %3907 = vmatpush1.bf16.msra.mxu0 %v4449_v17  ;;  %v1422_v16 = vld [vmem:[#allocation6 + $0x110] sm:$0xff] }
 0x273   :  { %3781 = vmatprep.subr.bf16.mxu1 %v4386_v56  ;;  %3909 = vmatprep.subr.bf16.mxu0 %v4450_v57  ;;  %v1426_v17 = vld [vmem:[#allocation6 + $0x130] sm:$0xff]  ;;  %v1455_v56 = vld [vmem:[#allocation6 + $0x218] sm:$0xff] }
 0x274   :  { %2546 = vmatprep.mubr.f32.mxu1 %v4921_v42  ;;  %2688 = vmatprep.mubr.f32.mxu0 %v4921_v42  ;;  %v4392_v1 = vcombine.high %v1422_v16, %v1426_v17  ;;  %v4456_v42 = vcombine.high %v1423_v23, %v1427_v9  ;;  %v4393_v22 = vcombine.low %v1422_v16, %v1426_v17  ;;  %v1459_v57 = vld [vmem:[#allocation6 + $0x238] sm:$0xff] }
 0x275   :  { %v4464_v61 = vcombine.high %v1455_v56, %v1459_v57  ;;  %v4465_v44 = vcombine.low %v1455_v56, %v1459_v57 }
 0x276   :  { %3783 = vmatpush1.bf16.msra.mxu1 %v4387_v62  ;;  %3911 = vmatpush1.bf16.msra.mxu0 %v4451_v63  ;;  %v1462_v62 = vld [vmem:[#allocation6 + $0x250] sm:$0xff] }
 0x277   :  { %3785 = vmatprep.subr.bf16.mxu1 %v4388_v2  ;;  %3913 = vmatprep.subr.bf16.mxu0 %v4452_v3  ;;  %v1466_v63 = vld [vmem:[#allocation6 + $0x270] sm:$0xff]  ;;  %v1463_v2 = vld [vmem:[#allocation6 + $0x258] sm:$0xff] }
 0x278   :  { %v1467_v3 = vld [vmem:[#allocation6 + $0x278] sm:$0xff]  ;;  %v4402_v5 = vcombine.high %v1462_v62, %v1466_v63  ;;  %v4403_v16 = vcombine.low %v1462_v62, %v1466_v63 }
 0x279   :  { %v4466_v8 = vcombine.high %v1463_v2, %v1467_v3  ;;  %v4467_v17 = vcombine.low %v1463_v2, %v1467_v3 }
 0x27a   :  { %3787 = vmatpush1.bf16.msra.mxu1 %v4389_v11  ;;  %3915 = vmatpush1.bf16.msra.mxu0 %v4453_v12  ;;  %v1470_v11 = vld [vmem:[#allocation6 + $0x290] sm:$0xff] }
 0x27b   :  { %3789 = vmatprep.subr.bf16.mxu1 %v4390_v13  ;;  %3917 = vmatprep.subr.bf16.mxu0 %v4454_v15  ;;  %v1474_v12 = vld [vmem:[#allocation6 + $0x2b0] sm:$0xff]  ;;  %v1471_v13 = vld [vmem:[#allocation6 + $0x298] sm:$0xff] }
 0x27c   :  { %v1475_v15 = vld [vmem:[#allocation6 + $0x2b8] sm:$0xff]  ;;  %v4404_v23 = vcombine.high %v1470_v11, %v1474_v12  ;;  %v4405_v18 = vcombine.low %v1470_v11, %v1474_v12 }
 0x27d   :  { %v4468_v9 = vcombine.high %v1471_v13, %v1475_v15  ;;  %v4469_v19 = vcombine.low %v1471_v13, %v1475_v15 }
 0x27e   :  { %3791 = vmatpush1.bf16.msra.mxu1 %v4391_v10  ;;  %3919 = vmatpush1.bf16.msra.mxu0 %v4455_v14  ;;  %v1478_v10 = vld [vmem:[#allocation6 + $0x2d0] sm:$0xff] }
 0x27f   :  { %3793 = vmatprep.subr.bf16.mxu1 %v4392_v1  ;;  %3921 = vmatprep.subr.bf16.mxu0 %v4456_v42  ;;  %v1482_v14 = vld [vmem:[#allocation6 + $0x2f0] sm:$0xff]  ;;  %v1479_v1 = vld [vmem:[#allocation6 + $0x2d8] sm:$0xff] }
 0x280   :  { %v1483_v42 = vld [vmem:[#allocation6 + $0x2f8] sm:$0xff]  ;;  %v4406_v20 = vcombine.high %v1478_v10, %v1482_v14  ;;  %v4407_v26 = vcombine.low %v1478_v10, %v1482_v14 }
 0x281   :  { %v4470_v21 = vcombine.high %v1479_v1, %v1483_v42  ;;  %v4471_v27 = vcombine.low %v1479_v1, %v1483_v42 }
 0x282   :  { %3795 = vmatpush1.bf16.msra.mxu1 %v4393_v22  ;;  %3923 = vmatpush1.bf16.msra.mxu0 %v4457_v7  ;;  %v1486_v22 = vld [vmem:[#allocation6 + $0x310] sm:$0xff] }
 0x283   :  { %3797 = vmatprep.subr.bf16.mxu1 %v4394_v0  ;;  %3925 = vmatprep.subr.bf16.mxu0 %v4458_v25  ;;  %v1490_v7 = vld [vmem:[#allocation6 + $0x330] sm:$0xff]  ;;  %v1487_v0 = vld [vmem:[#allocation6 + $0x318] sm:$0xff] }
 0x284   :  { %v1491_v25 = vld [vmem:[#allocation6 + $0x338] sm:$0xff]  ;;  %v4408_v28 = vcombine.high %v1486_v22, %v1490_v7  ;;  %v4409_v37 = vcombine.low %v1486_v22, %v1490_v7 }
 0x285   :  { %v4472_v29 = vcombine.high %v1487_v0, %v1491_v25  ;;  %v4473_v38 = vcombine.low %v1487_v0, %v1491_v25 }
 0x286   :  { %3799 = vmatpush1.bf16.msra.mxu1 %v4395_v31  ;;  %3927 = vmatpush1.bf16.msra.mxu0 %v4459_v35  ;;  %v1494_v31 = vld [vmem:[#allocation6 + $0x350] sm:$0xff] }
 0x287   :  { %3801 = vmatprep.subr.bf16.mxu1 %v4396_v36  ;;  %3929 = vmatprep.subr.bf16.mxu0 %v4460_v45  ;;  %v1498_v35 = vld [vmem:[#allocation6 + $0x370] sm:$0xff]  ;;  %v1495_v36 = vld [vmem:[#allocation6 + $0x358] sm:$0xff] }
 0x288   :  { %v1499_v45 = vld [vmem:[#allocation6 + $0x378] sm:$0xff]  ;;  %v4410_v39 = vcombine.high %v1494_v31, %v1498_v35  ;;  %v4411_v49 = vcombine.low %v1494_v31, %v1498_v35 }
 0x289   :  { %v4474_v40 = vcombine.high %v1495_v36, %v1499_v45  ;;  %v4475_v50 = vcombine.low %v1495_v36, %v1499_v45  ;;  %v1550_v45 = vld [vmem:[#allocation6 + $0x510] sm:$0xff] }
 0x28a   :  { %3803 = vmatpush1.bf16.msra.mxu1 %v4397_v41  ;;  %3931 = vmatpush1.bf16.msra.mxu0 %v4461_v43  ;;  %v1502_v41 = vld [vmem:[#allocation6 + $0x390] sm:$0xff] }
 0x28b   :  { %3805 = vmatprep.subr.bf16.mxu1 %v4398_v47  ;;  %3933 = vmatprep.subr.bf16.mxu0 %v4462_v48  ;;  %v1506_v43 = vld [vmem:[#allocation6 + $0x3b0] sm:$0xff]  ;;  %v1503_v47 = vld [vmem:[#allocation6 + $0x398] sm:$0xff] }
 0x28c   :  { %v1507_v48 = vld [vmem:[#allocation6 + $0x3b8] sm:$0xff]  ;;  %v4412_v56 = vcombine.high %v1502_v41, %v1506_v43  ;;  %v4413_v62 = vcombine.low %v1502_v41, %v1506_v43 }
 0x28d   :  { %v4476_v57 = vcombine.high %v1503_v47, %v1507_v48  ;;  %v4477_v63 = vcombine.low %v1503_v47, %v1507_v48  ;;  %v1558_v47 = vld [vmem:[#allocation6 + $0x550] sm:$0xff] }
 0x28e   :  { %3807 = vmatpush1.bf16.msra.mxu1 %v4399_v58  ;;  %3935 = vmatpush1.bf16.msra.mxu0 %v4463_v59  ;;  %v1510_v58 = vld [vmem:[#allocation6 + $0x3d0] sm:$0xff] }
 0x28f   :  { %3809 = vmatprep.subr.bf16.mxu1 %v4400_v60  ;;  %3937 = vmatprep.subr.bf16.mxu0 %v4464_v61  ;;  %v1514_v59 = vld [vmem:[#allocation6 + $0x3f0] sm:$0xff]  ;;  %v1511_v60 = vld [vmem:[#allocation6 + $0x3d8] sm:$0xff] }
 0x290   :  { %v1515_v61 = vld [vmem:[#allocation6 + $0x3f8] sm:$0xff]  ;;  %v4414_v2 = vcombine.high %v1510_v58, %v1514_v59  ;;  %v4415_v11 = vcombine.low %v1510_v58, %v1514_v59  ;;  %v1562_v48 = vld [vmem:[#allocation6 + $0x570] sm:$0xff] }
 0x291   :  { %v4478_v3 = vcombine.high %v1511_v60, %v1515_v61  ;;  %v4479_v12 = vcombine.low %v1511_v60, %v1515_v61  ;;  %v4426_v58 = vcombine.high %v1558_v47, %v1562_v48  ;;  %v1566_v60 = vld [vmem:[#allocation6 + $0x590] sm:$0xff] }
 0x292   :  { %3811 = vmatpush1.bf16.msra.mxu1 %v4401_v4  ;;  %3939 = vmatpush1.bf16.msra.mxu0 %v4465_v44  ;;  %v1518_v4 = vld [vmem:[#allocation6 + $0x410] sm:$0xff] }
 0x293   :  { %3813 = vmatprep.subr.bf16.mxu1 %v4402_v5  ;;  %3941 = vmatprep.subr.bf16.mxu0 %v4466_v8  ;;  %v1522_v44 = vld [vmem:[#allocation6 + $0x430] sm:$0xff]  ;;  %v1519_v5 = vld [vmem:[#allocation6 + $0x418] sm:$0xff] }
 0x294   :  { %v1523_v8 = vld [vmem:[#allocation6 + $0x438] sm:$0xff]  ;;  %v4416_v13 = vcombine.high %v1518_v4, %v1522_v44  ;;  %v4417_v10 = vcombine.low %v1518_v4, %v1522_v44  ;;  %v1570_v61 = vld [vmem:[#allocation6 + $0x5b0] sm:$0xff] }
 0x295   :  { %v4480_v15 = vcombine.high %v1519_v5, %v1523_v8  ;;  %v4481_v14 = vcombine.low %v1519_v5, %v1523_v8  ;;  %v4428_v4 = vcombine.high %v1566_v60, %v1570_v61  ;;  %v1574_v5 = vld [vmem:[#allocation6 + $0x5d0] sm:$0xff] }
 0x296   :  { %3815 = vmatpush1.bf16.msra.mxu1 %v4403_v16  ;;  %3943 = vmatpush1.bf16.msra.mxu0 %v4467_v17  ;;  %v1526_v16 = vld [vmem:[#allocation6 + $0x450] sm:$0xff] }
 0x297   :  { %3817 = vmatprep.subr.bf16.mxu1 %v4404_v23  ;;  %3945 = vmatprep.subr.bf16.mxu0 %v4468_v9  ;;  %v1530_v17 = vld [vmem:[#allocation6 + $0x470] sm:$0xff]  ;;  %v1527_v23 = vld [vmem:[#allocation6 + $0x458] sm:$0xff] }
 0x298   :  { %v1531_v9 = vld [vmem:[#allocation6 + $0x478] sm:$0xff]  ;;  %v4418_v1 = vcombine.high %v1526_v16, %v1530_v17  ;;  %v4419_v22 = vcombine.low %v1526_v16, %v1530_v17  ;;  %v1578_v8 = vld [vmem:[#allocation6 + $0x5f0] sm:$0xff] }
 0x299   :  { %v4482_v42 = vcombine.high %v1527_v23, %v1531_v9  ;;  %v4483_v7 = vcombine.low %v1527_v23, %v1531_v9  ;;  %v4430_v16 = vcombine.high %v1574_v5, %v1578_v8  ;;  %v1582_v23 = vld [vmem:[#allocation6 + $0x610] sm:$0xff] }
 0x29a   :  { %3819 = vmatpush1.bf16.msra.mxu1 %v4405_v18  ;;  %3947 = vmatpush1.bf16.msra.mxu0 %v4469_v19  ;;  %v1534_v18 = vld [vmem:[#allocation6 + $0x490] sm:$0xff] }
 0x29b   :  { %3821 = vmatprep.subr.bf16.mxu1 %v4406_v20  ;;  %3949 = vmatprep.subr.bf16.mxu0 %v4470_v21  ;;  %v1538_v19 = vld [vmem:[#allocation6 + $0x4b0] sm:$0xff]  ;;  %v1535_v20 = vld [vmem:[#allocation6 + $0x498] sm:$0xff] }
 0x29c   :  { %v1539_v21 = vld [vmem:[#allocation6 + $0x4b8] sm:$0xff]  ;;  %v4420_v0 = vcombine.high %v1534_v18, %v1538_v19  ;;  %v1586_v9 = vld [vmem:[#allocation6 + $0x630] sm:$0xff] }
 0x29d   :  { %v4484_v25 = vcombine.high %v1535_v20, %v1539_v21  ;;  %v4485_v31 = vcombine.low %v1535_v20, %v1539_v21  ;;  %v1590_v20 = vld [vmem:[#allocation6 + $0x650] sm:$0xff] }
 0x29e   :  { %3823 = vmatpush1.bf16.msra.mxu1 %v4407_v26  ;;  %3951 = vmatpush1.bf16.msra.mxu0 %v4471_v27  ;;  %v1542_v26 = vld [vmem:[#allocation6 + $0x4d0] sm:$0xff] }
 0x29f   :  { %3825 = vmatprep.subr.bf16.mxu1 %v4408_v28  ;;  %3953 = vmatprep.subr.bf16.mxu0 %v4472_v29  ;;  %v1546_v27 = vld [vmem:[#allocation6 + $0x4f0] sm:$0xff]  ;;  %v1543_v28 = vld [vmem:[#allocation6 + $0x4d8] sm:$0xff] }
 0x2a0   :  { %v1547_v29 = vld [vmem:[#allocation6 + $0x4f8] sm:$0xff]  ;;  %v4422_v35 = vcombine.high %v1542_v26, %v1546_v27  ;;  %v1594_v21 = vld [vmem:[#allocation6 + $0x670] sm:$0xff] }
 0x2a1   :  { %v4486_v36 = vcombine.high %v1543_v28, %v1547_v29 }
 0x2a2   :  { %3827 = vmatpush1.bf16.msra.mxu1 %v4409_v37  ;;  %3955 = vmatpush1.bf16.msra.mxu0 %v4473_v38  ;;  %v1554_v37 = vld [vmem:[#allocation6 + $0x530] sm:$0xff]  ;;  %v1555_v38 = vld [vmem:[#allocation6 + $0x538] sm:$0xff] }
 0x2a3   :  { %3829 = vmatprep.subr.bf16.mxu1 %v4410_v39  ;;  %3957 = vmatprep.subr.bf16.mxu0 %v4474_v40  ;;  %v4423_v39 = vcombine.low %v1542_v26, %v1546_v27  ;;  %v4487_v40 = vcombine.low %v1543_v28, %v1547_v29  ;;  %v4424_v41 = vcombine.high %v1550_v45, %v1554_v37  ;;  %v1598_v28 = vld [vmem:[#allocation6 + $0x690] sm:$0xff] }
 0x2a4   :  { %v4434_v26 = vcombine.high %v1590_v20, %v1594_v21  ;;  %v1602_v29 = vld [vmem:[#allocation6 + $0x6b0] sm:$0xff] }
 0x2a6   :  { %3831 = vmatpush1.bf16.msra.mxu1 %v4411_v49  ;;  %3959 = vmatpush1.bf16.msra.mxu0 %v4475_v50  ;;  %v1559_v49 = vld [vmem:[#allocation6 + $0x558] sm:$0xff] }
 0x2a7   :  { %3833 = vmatprep.subr.bf16.mxu1 %v4412_v56  ;;  %3961 = vmatprep.subr.bf16.mxu0 %v4476_v57  ;;  %v1563_v50 = vld [vmem:[#allocation6 + $0x578] sm:$0xff]  ;;  %v4425_v56 = vcombine.low %v1550_v45, %v1554_v37  ;;  %v4436_v45 = vcombine.high %v1598_v28, %v1602_v29 }
 0x2a8   :  { %v4490_v59 = vcombine.high %v1559_v49, %v1563_v50 }
 0x2aa   :  { %3835 = vmatpush1.bf16.msra.mxu1 %v4413_v62  ;;  %3963 = vmatpush1.bf16.msra.mxu0 %v4477_v63  ;;  %v1567_v62 = vld [vmem:[#allocation6 + $0x598] sm:$0xff] }
 0x2ab   :  { %3837 = vmatprep.subr.bf16.mxu1 %v4414_v2  ;;  %3965 = vmatprep.subr.bf16.mxu0 %v4478_v3  ;;  %v1571_v63 = vld [vmem:[#allocation6 + $0x5b8] sm:$0xff]  ;;  %v4427_v2 = vcombine.low %v1558_v47, %v1562_v48  ;;  %v4491_v3 = vcombine.low %v1559_v49, %v1563_v50  ;;  %v1614_v49 = vld [vmem:[#allocation6 + $0x710] sm:$0xff] }
 0x2ac   :  { %v4492_v44 = vcombine.high %v1567_v62, %v1571_v63  ;;  %v1618_v50 = vld [vmem:[#allocation6 + $0x730] sm:$0xff] }
 0x2ae   :  { %3839 = vmatpush1.bf16.msra.mxu1 %v4415_v11  ;;  %3967 = vmatpush1.bf16.msra.mxu0 %v4479_v12  ;;  %v1575_v11 = vld [vmem:[#allocation6 + $0x5d8] sm:$0xff] }
 0x2af   :  { %3841 = vmatprep.subr.bf16.mxu1 %v4416_v13  ;;  %3969 = vmatprep.subr.bf16.mxu0 %v4480_v15  ;;  %v1579_v12 = vld [vmem:[#allocation6 + $0x5f8] sm:$0xff]  ;;  %v4429_v13 = vcombine.low %v1566_v60, %v1570_v61  ;;  %v4493_v15 = vcombine.low %v1567_v62, %v1571_v63  ;;  %v4440_v60 = vcombine.high %v1614_v49, %v1618_v50  ;;  %v1622_v62 = vld [vmem:[#allocation6 + $0x750] sm:$0xff] }
 0x2b0   :  { %v4494_v17 = vcombine.high %v1575_v11, %v1579_v12  ;;  %v1626_v63 = vld [vmem:[#allocation6 + $0x770] sm:$0xff] }
 0x2b1   :  { %2547 = vmatmul.mubr.f32.vlgmr.msra.gmra.mrb[6].mxu1 %v4928_v24  ;;  %2689 = vmatmul.mubr.f32.vlgmr.msra.gmra.mrb[8].mxu0 %v4928_v24  ;;  %v4421_v24 = vcombine.low %v1534_v18, %v1538_v19  ;;  %v4432_v18 = vcombine.high %v1582_v23, %v1586_v9 }
 0x2b2   :  { %3843 = vmatpush1.bf16.msra.mxu1 %v4417_v10  ;;  %2617 = vmatprep.mubr.f32.mxu1 %v4989_v53  ;;  %v1583_v10 = vld [vmem:[#allocation6 + $0x618] sm:$0xff] }
 0x2b3   :  { %3971 = vmatpush1.bf16.msra.mxu0 %v4481_v14  ;;  %2759 = vmatprep.mubr.f32.mxu0 %v4989_v53  ;;  %v1551_v53 = vld [vmem:[#allocation6 + $0x518] sm:$0xff] }
 0x2b4   :  { %3845 = vmatprep.subr.bf16.mxu1 %v4418_v1  ;;  %3973 = vmatprep.subr.bf16.mxu0 %v4482_v42  ;;  %v4488_v43 = vcombine.high %v1551_v53, %v1555_v38  ;;  %v4489_v57 = vcombine.low %v1551_v53, %v1555_v38  ;;  %v1587_v14 = vld [vmem:[#allocation6 + $0x638] sm:$0xff]  ;;  %v4431_v1 = vcombine.low %v1574_v5, %v1578_v8  ;;  %v1606_v53 = vld [vmem:[#allocation6 + $0x6d0] sm:$0xff] }
 0x2b5   :  { %v4495_v42 = vcombine.low %v1575_v11, %v1579_v12  ;;  %v4496_v19 = vcombine.high %v1583_v10, %v1587_v14  ;;  %v1610_v38 = vld [vmem:[#allocation6 + $0x6f0] sm:$0xff]  ;;  %v4442_v5 = vcombine.high %v1622_v62, %v1626_v63 }
 0x2b6   :  { %3847 = vmatpush1.bf16.msra.mxu1 %v4419_v22  ;;  %v1591_v22 = vld [vmem:[#allocation6 + $0x658] sm:$0xff]  ;;  %v4438_v47 = vcombine.high %v1606_v53, %v1610_v38  ;;  %v1630_v11 = vld [vmem:[#allocation6 + $0x790] sm:$0xff] }
 0x2b7   :  { %3975 = vmatpush1.bf16.msra.mxu0 %v4483_v7  ;;  %3849 = vmatprep.subr.bf16.mxu1 %v4420_v0  ;;  %v1595_v7 = vld [vmem:[#allocation6 + $0x678] sm:$0xff]  ;;  %v4433_v0 = vcombine.low %v1582_v23, %v1586_v9  ;;  %v1634_v12 = vld [vmem:[#allocation6 + $0x7b0] sm:$0xff] }
 0x2b8   :  { %3977 = vmatprep.subr.bf16.mxu0 %v4484_v25  ;;  %v4497_v25 = vcombine.low %v1583_v10, %v1587_v14  ;;  %v4498_v27 = vcombine.high %v1591_v22, %v1595_v7  ;;  %v4444_v23 = vcombine.high %v1630_v11, %v1634_v12  ;;  %v1638_v10 = vld [vmem:[#allocation6 + $0x7d0] sm:$0xff] }
 0x2b9   :  { %v1642_v14 = vld [vmem:[#allocation6 + $0x7f0] sm:$0xff] }
 0x2ba   :  { %3851 = vmatpush1.bf16.msra.mxu1 %v4421_v24  ;;  %v1599_v24 = vld [vmem:[#allocation6 + $0x698] sm:$0xff] }
 0x2bb   :  { %3979 = vmatpush1.bf16.msra.mxu0 %v4485_v31  ;;  %3853 = vmatprep.subr.bf16.mxu1 %v4422_v35  ;;  %v1603_v31 = vld [vmem:[#allocation6 + $0x6b8] sm:$0xff]  ;;  %v4435_v35 = vcombine.low %v1590_v20, %v1594_v21  ;;  %v4446_v20 = vcombine.high %v1638_v10, %v1642_v14 }
 0x2bc   :  { %3981 = vmatprep.subr.bf16.mxu0 %v4486_v36  ;;  %v4499_v36 = vcombine.low %v1591_v22, %v1595_v7  ;;  %v4500_v37 = vcombine.high %v1599_v24, %v1603_v31  ;;  %v4447_v22 = vcombine.low %v1638_v10, %v1642_v14 }
 0x2be   :  { %3855 = vmatpush1.bf16.msra.mxu1 %v4423_v39  ;;  %v1607_v39 = vld [vmem:[#allocation6 + $0x6d8] sm:$0xff] }
 0x2bf   :  { %3983 = vmatpush1.bf16.msra.mxu0 %v4487_v40  ;;  %3857 = vmatprep.subr.bf16.mxu1 %v4424_v41  ;;  %v1611_v40 = vld [vmem:[#allocation6 + $0x6f8] sm:$0xff]  ;;  %v4437_v41 = vcombine.low %v1598_v28, %v1602_v29  ;;  %v3081_v28 = vld [vmem:[%s5116_s8 + $0x40] sm:$0xff]  }
 0x2c0   :  { %3985 = vmatprep.subr.bf16.mxu0 %v4488_v43  ;;  %v4501_v43 = vcombine.low %v1599_v24, %v1603_v31  ;;  %v4502_v48 = vcombine.high %v1607_v39, %v1611_v40  ;;  %v3011_v29 = vld [vmem:[%s5116_s8] sm:$0xff]   ;;  %v3082_v24 = vld [vmem:[%s5116_s8 + $0x48] sm:$0xff]   ;;  %v3083_v31 = vld [vmem:[%s5116_s8 + $0x50] sm:$0xff]  }
 0x2c2   :  { %3859 = vmatpush1.bf16.msra.mxu1 %v4425_v56  ;;  %v1615_v56 = vld [vmem:[#allocation6 + $0x718] sm:$0xff] }
 0x2c3   :  { %3987 = vmatpush1.bf16.msra.mxu0 %v4489_v57  ;;  %3861 = vmatprep.subr.bf16.mxu1 %v4426_v58  ;;  %v1619_v57 = vld [vmem:[#allocation6 + $0x738] sm:$0xff]  ;;  %v4439_v58 = vcombine.low %v1606_v53, %v1610_v38  ;;  %v3077_v53 = vld [vmem:[%s5116_s8 + $0x20] sm:$0xff]   ;;  %v3086_v38 = vld [vmem:[%s5116_s8 + $0x68] sm:$0xff]  }
 0x2c4   :  { %3989 = vmatprep.subr.bf16.mxu0 %v4490_v59  ;;  %v4503_v59 = vcombine.low %v1607_v39, %v1611_v40  ;;  %v4504_v61 = vcombine.high %v1615_v56, %v1619_v57  ;;  %v3078_v39 = vld [vmem:[%s5116_s8 + $0x28] sm:$0xff]   ;;  %v3087_v40 = vld [vmem:[%s5116_s8 + $0x70] sm:$0xff]  }
 0x2c6   :  { %3863 = vmatpush1.bf16.msra.mxu1 %v4427_v2  ;;  %v1623_v2 = vld [vmem:[#allocation6 + $0x758] sm:$0xff] }
 0x2c7   :  { %3991 = vmatpush1.bf16.msra.mxu0 %v4491_v3  ;;  %3865 = vmatprep.subr.bf16.mxu1 %v4428_v4  ;;  %v1627_v3 = vld [vmem:[#allocation6 + $0x778] sm:$0xff]  ;;  %v4441_v4 = vcombine.low %v1614_v49, %v1618_v50 }
 0x2c8   :  { %3993 = vmatprep.subr.bf16.mxu0 %v4492_v44  ;;  %v4505_v44 = vcombine.low %v1615_v56, %v1619_v57  ;;  %v4506_v8 = vcombine.high %v1623_v2, %v1627_v3 }
 0x2ca   :  { %3867 = vmatpush1.bf16.msra.mxu1 %v4429_v13  ;;  %v1631_v13 = vld [vmem:[#allocation6 + $0x798] sm:$0xff] }
 0x2cb   :  { %3995 = vmatpush1.bf16.msra.mxu0 %v4493_v15  ;;  %3869 = vmatprep.subr.bf16.mxu1 %v4430_v16  ;;  %v1635_v15 = vld [vmem:[#allocation6 + $0x7b8] sm:$0xff]  ;;  %v4443_v16 = vcombine.low %v1622_v62, %v1626_v63 }
 0x2cc   :  { %3997 = vmatprep.subr.bf16.mxu0 %v4494_v17  ;;  %v4507_v17 = vcombine.low %v1623_v2, %v1627_v3  ;;  %v4508_v9 = vcombine.high %v1631_v13, %v1635_v15 }
 0x2ce   :  { %3871 = vmatpush1.bf16.msra.mxu1 %v4431_v1  ;;  %v1639_v1 = vld [vmem:[#allocation6 + $0x7d8] sm:$0xff] }
 0x2cf   :  { %3999 = vmatpush1.bf16.msra.mxu0 %v4495_v42  ;;  %3873 = vmatprep.subr.bf16.mxu1 %v4432_v18  ;;  %v1643_v42 = vld [vmem:[#allocation6 + $0x7f8] sm:$0xff]  ;;  %v4445_v18 = vcombine.low %v1630_v11, %v1634_v12 }
 0x2d0   :  { %4001 = vmatprep.subr.bf16.mxu0 %v4496_v19  ;;  %v4509_v19 = vcombine.low %v1631_v13, %v1635_v15  ;;  %v4510_v21 = vcombine.high %v1639_v1, %v1643_v42  ;;  %v4511_v7 = vcombine.low %v1639_v1, %v1643_v42 }
 0x2d2   :  { %3875 = vmatpush1.bf16.msra.mxu1 %v4433_v0 }
 0x2d3   :  { %4003 = vmatpush1.bf16.msra.mxu0 %v4497_v25  ;;  %3877 = vmatprep.subr.bf16.mxu1 %v4434_v26 }
 0x2d4   :  { %4005 = vmatprep.subr.bf16.mxu0 %v4498_v27 }
 0x2d6   :  { %3879 = vmatpush1.bf16.msra.mxu1 %v4435_v35  ;;  %v3075_v35 = vld [vmem:[%s5116_s8 + $0x10] sm:$0xff]  }
 0x2d7   :  { %4007 = vmatpush1.bf16.msra.mxu0 %v4499_v36  ;;  %3881 = vmatprep.subr.bf16.mxu1 %v4436_v45  ;;  %v3084_v36 = vld [vmem:[%s5116_s8 + $0x58] sm:$0xff]  }
 0x2d8   :  { %4009 = vmatprep.subr.bf16.mxu0 %v4500_v37  ;;  %v3076_v45 = vld [vmem:[%s5116_s8 + $0x18] sm:$0xff]   ;;  %v3085_v37 = vld [vmem:[%s5116_s8 + $0x60] sm:$0xff]  }
 0x2da   :  { %3883 = vmatpush1.bf16.msra.mxu1 %v4437_v41  ;;  %v3079_v41 = vld [vmem:[%s5116_s8 + $0x30] sm:$0xff]  }
 0x2db   :  { %4011 = vmatpush1.bf16.msra.mxu0 %v4501_v43  ;;  %3885 = vmatprep.subr.bf16.mxu1 %v4438_v47  ;;  %v3088_v43 = vld [vmem:[%s5116_s8 + $0x78] sm:$0xff]  }
 0x2dc   :  { %4013 = vmatprep.subr.bf16.mxu0 %v4502_v48  ;;  %v3080_v47 = vld [vmem:[%s5116_s8 + $0x38] sm:$0xff]   ;;  %v2156_v48 = vld [vmem:[%s5115_s7] sm:$0xff] }
 0x2dd   :  { %v2161_v49 = vrot.slane %v2156_v48, %v724_v30  ;;  %v2169_v50 = vrot.slane %v2156_v48, %v732_v32  ;;  %v2165_v56 = vrot.slane %v2156_v48, %v728_v33  ;;  %v2173_v57 = vrot.slane %v2156_v48, %v736_v34 }
 0x2de   :  { %3887 = vmatpush1.bf16.msra.mxu1 %v4439_v58  ;;  %v2177_v34 = vrot.slane %v2156_v48, %v740_v51  ;;  %v2185_v12 = vrot.slane %v2156_v48, %v748_v52  ;;  %v2181_v13 = vrot.slane %v2156_v48, %v744_v54  ;;  %v2189_v15 = vrot.slane %v2156_v48, %v752_v55 }
 0x2df   :  { %4015 = vmatpush1.bf16.msra.mxu0 %v4503_v59  ;;  %3889 = vmatprep.subr.bf16.mxu1 %v4440_v60 }
 0x2e0   :  { %4017 = vmatprep.subr.bf16.mxu0 %v4504_v61 }
 0x2e2   :  { %3891 = vmatpush1.bf16.msra.mxu1 %v4441_v4 }
 0x2e3   :  { %4019 = vmatpush1.bf16.msra.mxu0 %v4505_v44  ;;  %3893 = vmatprep.subr.bf16.mxu1 %v4442_v5 }
 0x2e4   :  { %4021 = vmatprep.subr.bf16.mxu0 %v4506_v8 }
 0x2e6   :  { %3895 = vmatpush1.bf16.msra.mxu1 %v4443_v16 }
 0x2e7   :  { %4023 = vmatpush1.bf16.msra.mxu0 %v4507_v17  ;;  %3897 = vmatprep.subr.bf16.mxu1 %v4444_v23 }
 0x2e8   :  { %4025 = vmatprep.subr.bf16.mxu0 %v4508_v9 }
 0x2ea   :  { %3899 = vmatpush1.bf16.msra.mxu1 %v4445_v18  ;;  %v84_v18 = vld [vmem:[%s5111_s3 + $0x10] sm:$0xff] }
 0x2eb   :  { %4027 = vmatpush1.bf16.msra.mxu0 %v4509_v19  ;;  %3901 = vmatprep.subr.bf16.mxu1 %v4446_v20  ;;  %v85_v20 = vld [vmem:[%s5111_s3 + $0x18] sm:$0xff] }
 0x2ec   :  { %4029 = vmatprep.subr.bf16.mxu0 %v4510_v21 }
 0x2ee   :  { %3903 = vmatpush1.bf16.msra.mxu1 %v4447_v22 }
 0x2ef   :  { %4031 = vmatpush1.bf16.msra.mxu0 %v4511_v7  ;;  %4033 = vmatprep.subr.bf16.mxu1 %v3081_v28 }
 0x2f1   :  { %2618 = vmatmul.mubr.f32.vlgmr.msra.gmra.mrb[6].mxu1 %v4987_v46 }
 0x2f2   :  { %2760 = vmatmul.mubr.f32.vlgmr.msra.gmra.mrb[8].mxu0 %v4987_v46  ;;  %4035 = vmatpush3.bf16.msra.mxu1 %v3011_v29  ;;  %v3074_v46 = vld [vmem:[%s5116_s8 + $0x8] sm:$0xff]  }
 0x2f3   :  { %4037 = vmatprep.subr.bf16.mxu1 %v3082_v24 }
 0x2f6   :  { %4039 = vmatpush3.bf16.msra.mxu1 %v3074_v46 }
 0x2f7   :  { %4041 = vmatprep.subr.bf16.mxu1 %v3083_v31 }
 0x2fa   :  { %4043 = vmatpush3.bf16.msra.mxu1 %v3075_v35 }
 0x2fb   :  { %4045 = vmatprep.subr.bf16.mxu1 %v3084_v36 }
 0x2fe   :  { %4047 = vmatpush3.bf16.msra.mxu1 %v3076_v45 }
 0x2ff   :  { %4049 = vmatprep.subr.bf16.mxu1 %v3085_v37 }
 0x302   :  { %4051 = vmatpush3.bf16.msra.mxu1 %v3077_v53 }
 0x303   :  { %4053 = vmatprep.subr.bf16.mxu1 %v3086_v38 }
 0x306   :  { %4055 = vmatpush3.bf16.msra.mxu1 %v3078_v39 }
 0x307   :  { %4057 = vmatprep.subr.bf16.mxu1 %v3087_v40  ;;  %v3005_v40 = vld [vmem:[%s5117_s9] ss:$0 sm:$0xff] }
 0x30a   :  { %4059 = vmatpush3.bf16.msra.mxu1 %v3079_v41 }
 0x30b   :  { %4061 = vmatprep.subr.bf16.mxu1 %v3088_v43 }
 0x30e   :  { %4063 = vmatpush3.bf16.msra.mxu1 %v3080_v47 }
 0x344   :  { %v2335_v0 = vpop.f32.mrb[4].mxu1  ;;  %v2477_v25 = vpop.f32.mrb[6].mxu0 }
 0x345   :  { %v2337_v26 = vpop.f32.mrb[5].mxu1  ;;  %v2479_v27 = vpop.f32.mrb[7].mxu0  ;;  %v4072_v58 = vadd.f32 %v2335_v0, %v2161_v49  ;;  %v4074_v59 = vadd.f32 %v2477_v25, %v2169_v50 }
 0x346   :  { %v4073_v60 = vadd.f32 %v2337_v26, %v2165_v56  ;;  %v4075_v61 = vadd.f32 %v2479_v27, %v2173_v57 }
 0x347   :  { %v2999_v62 = vmul.f32 -1.442695, %v4072_v58  ;;  %v3001_v63 = vmul.f32 -1.442695, %v4074_v59 }
 0x348   :  { %v3000_v2 = vmul.f32 -1.442695, %v4073_v60  ;;  %v3002_v3 = vmul.f32 -1.442695, %v4075_v61 }
 0x349   :  { %4552 = vpow2.f32 %v2999_v62 }
 0x34a   :  { %4554 = vpow2.f32 %v3001_v63 }
 0x34b   :  { %4556 = vpow2.f32 %v3000_v2 }
 0x34c   :  { %4558 = vpow2.f32 %v3002_v3 }
 0x353   :  { %v4553_v30 = vpop.eup %4552 }
 0x354   :  { %v4555_v32 = vpop.eup %4554  ;;  %v2772_v33 = vadd.f32 1.0, %v4553_v30 }
 0x355   :  { %v4557_v4 = vpop.eup %4556  ;;  %v2784_v5 = vadd.f32 1.0, %v4555_v32 }
 0x356   :  { %v4559_v44 = vpop.eup %4558  ;;  %v2773_v8 = vadd.f32 1.0, %v4557_v4  ;;  %4560 = vrcp.f32 %v2772_v33 }
 0x357   :  { %v2785_v11 = vadd.f32 1.0, %v4559_v44  ;;  %4562 = vrcp.f32 %v2784_v5 }
 0x358   :  { %4564 = vrcp.f32 %v2773_v8 }
 0x359   :  { %4566 = vrcp.f32 %v2785_v11 }
 0x360   :  { %v4561_v54 = vpop.eup %4560 }
 0x361   :  { %v4563_v6 = vpop.eup %4562 }
 0x362   :  { %v4565_v55 = vpop.eup %4564  ;;  %v2804_v7 = vmul.f32 %v4563_v6, %v84_v18 }
 0x363   :  { %v4567_v19 = vpop.eup %4566 }
 0x364   :  { %v2805_v25 = vmul.f32 %v4567_v19, %v85_v20 }
 0x3c4   :  { %v2619_v16 = vpop.f32.mrb[6].mxu1 }
 0x3c5   :  { %v4076_v17 = vadd.f32 %v2619_v16, %v2177_v34  ;;  %v2761_v23 = vpop.f32.mrb[8].mxu0  ;;  %v2621_v9 = vpop.f32.mrb[7].mxu1 }
 0x3c6   :  { %v4078_v10 = vadd.f32 %v2761_v23, %v2185_v12  ;;  %v4077_v51 = vadd.f32 %v2621_v9, %v2181_v13  ;;  %v2763_v14 = vpop.f32.mrb[9].mxu0 }
 0x3c7   :  { %4568 = vtanh.f32 %v4076_v17  ;;  %v4079_v1 = vadd.f32 %v2763_v14, %v2189_v15 }
 0x3c8   :  { %v3003_v52 = vmul.f32 -1.442695, %v4078_v10  ;;  %4570 = vtanh.f32 %v4077_v51 }
 0x3c9   :  { %v3004_v42 = vmul.f32 -1.442695, %v4079_v1 }
 0x3ca   :  { %4572 = vpow2.f32 %v3003_v52 }
 0x3cb   :  { %4574 = vpow2.f32 %v3004_v42 }
 0x3d1   :  { %v4569_v21 = vpop.eup %4568 }
 0x3d2   :  { %v4571_v22 = vpop.eup %4570  ;;  %v2806_v0 = vmul.f32 %v4569_v21, %v4561_v54 }
 0x3d3   :  { %v2807_v26 = vmul.f32 %v4571_v22, %v4565_v55 }
 0x3d4   :  { %v4573_v27 = vpop.eup %4572  ;;  %v2808_v28 = vadd.f32 %v2806_v0, %v2804_v7 }
 0x3d5   :  { %v4575_v29 = vpop.eup %4574  ;;  %v2798_v24 = vadd.f32 1.0, %v4573_v27  ;;  %v2809_v46 = vadd.f32 %v2807_v26, %v2805_v25 }
 0x3d6   :  { %4576 = vtanh.f32 %v2808_v28  ;;  %3008 = vst [vmem:[%s5120_s12 + $0x10] sm:$0xff] %v2808_v28  ;;  %v2799_v31 = vadd.f32 1.0, %v4575_v29 }
 0x3d7   :  { %4578 = vrcp.f32 %v2798_v24  ;;  %3009 = vst [vmem:[%s5120_s12 + $0x18] sm:$0xff] %v2809_v46 }
 0x3d8   :  { %4580 = vrcp.f32 %v2799_v31 }
 0x3d9   :  { %4582 = vtanh.f32 %v2809_v46 }
 0x3e0   :  { %v4577_v35 = vpop.eup %4576 }
 0x3e1   :  { %v4579_v36 = vpop.eup %4578 }
 0x3e2   :  { %v4581_v45 = vpop.eup %4580  ;;  %v2812_v37 = vmul.f32 %v4579_v36, %v4577_v35 }
 0x3e3   :  { %v4583_v53 = vpop.eup %4582 }
 0x3e4   :  { %v2813_v38 = vmul.f32 %v4583_v53, %v4581_v45  ;;  %3006 = vst [vmem:[%s5119_s11 + $0x10] sm:$0xff] %v2812_v37 }
 0x3e6   :  { %2949 = vmatprep.mubr.f32.mxu1 %v2813_v38  ;;  %3007 = vst [vmem:[%s5119_s11 + $0x18] sm:$0xff] %v2813_v38 }
 0x3e7   :  { %2950 = vmatmul.mubr.f32.vlgmr.msra.gmra.mrb[8].mxu1 %v2812_v37 }
 0x4ba   :  { %v3138_v39 = vpop.f32.mrb[8].mxu1 }
 0x4bb   :  { %v3139_v41 = vpop.f32.mrb[9].mxu1 }
 0x4bc   :  { %v3140_v43 = vadd.f32 %v3139_v41, %v3138_v39 }
 0x4be   :  { %v2952_v47 = vadd.f32 %v3140_v43, %v3005_v40 }
 0x4c0   :  { %2955 = vst [vmem:[%s5118_s10] sm:$0xff] %v2952_v47 }
 0x4c1   :  { %2976 = vsyncpa [#allocation5], 1 }
 0x4c2   :  { %2977 = vsyncpa [#allocation7], 1 }

</bundles_post_ra>
